<compile_context>
chip_gen: v7x
topology: tpu7x:2x2x1
jax: 0.10.0
libtpu: 0.0.40
codegen_flags: <defaults>
</compile_context>

<pallas_src>
import jax
import jax.numpy as jnp
from jax.experimental import pallas as pl
from jax.experimental.pallas import tpu as pltpu


# ----------------------------- Pallas kernel ------------------------------- #
def simclr_kernel(p_ref,      # (N*HW, 9C) im2col patches, bf16, UNPADDED
                  cw_ref,     # (Kp, F)    conv weight (im2col layout, zero-padded rows), bf16
                  cb_ref,     # (1, F)     conv bias, f32
                  w1_ref,     # (F, F)     projector linear 1 weight, bf16
                  b1_ref,     # (1, F)     projector linear 1 bias, f32
                  g_ref,      # (1, F)     BatchNorm1d gamma, f32
                  be_ref,     # (1, F)     BatchNorm1d beta, f32
                  w2_ref,     # (F, D)     projector linear 2 weight, bf16
                  b2_ref,     # (1, D)     projector linear 2 bias, f32
                  z_ref):     # (N, D)     output (L2-normalized embeddings), f32
    n, _ = z_ref.shape
    m, k = p_ref.shape
    kp, f = cw_ref.shape
    hw = m // n

    # ---- encoder: one batched conv-as-matmul (bf16 operands, f32 accum) ----
    p = p_ref[...]                                                 # (N*HW, 9C) bf16
    if kp > k:
        # Zero-pad the contraction dim to lane width ON-CHIP only (cheap
        # lane-concat in VMEM); the HBM stream stays unpadded.
        p = jnp.concatenate(
            [p, jnp.zeros((m, kp - k), dtype=p.dtype)], axis=1)    # (N*HW, Kp)
    y = jnp.dot(p, cw_ref[...],
                preferred_element_type=jnp.float32)                # (N*HW, F) f32
    y = jnp.maximum(y + cb_ref[...], 0.0)                          # bias + ReLU

    # ---- global average pool: VPU/XLU sublane reduction (no pool matmul) ----
    h = jnp.sum(y.reshape(n, hw, f), axis=1) * (1.0 / hw)          # (N, F) == encoder(x), fc=Identity

    # ---- projector: Linear -> BatchNorm1d (training batch stats) -> ReLU ----
    y1 = jnp.dot(h.astype(jnp.bfloat16), w1_ref[...],
                 preferred_element_type=jnp.float32) + b1_ref[...]   # (N, F) f32
    mu = jnp.mean(y1, axis=0, keepdims=True)
    var = jnp.mean((y1 - mu) ** 2, axis=0, keepdims=True)            # biased var (PyTorch BN)
    y1 = (y1 - mu) * jax.lax.rsqrt(var + 1e-5)                       # EUP rsqrt
    y1 = y1 * g_ref[...] + be_ref[...]
    y1 = jnp.maximum(y1, 0.0)

    # ---- projector: Linear -> F.normalize(dim=1) ----
    z = jnp.dot(y1.astype(jnp.bfloat16), w2_ref[...],
                preferred_element_type=jnp.float32) + b2_ref[...]    # (N, D) f32
    nrm2 = jnp.sum(z * z, axis=1, keepdims=True)
    inv = jax.lax.rsqrt(jnp.maximum(nrm2, 1e-24))    # == 1 / max(||z||, 1e-12), EUP path
    z_ref[...] = z * inv


# ------------------------------ host wrapper -------------------------------- #
def im2col_3x3_same(x_nhwc):
    """(N,H,W,C) -> (N, H*W, 9*C) patches for a 3x3, stride-1, pad-1 conv."""
    n, h, w, c = x_nhwc.shape
    xp = jnp.pad(x_nhwc, ((0, 0), (1, 1), (1, 1), (0, 0)))
    cols = [xp[:, dh:dh + h, dw:dw + w, :]
            for dh in range(3) for dw in range(3)]                # each (N,H,W,C)
    patches = jnp.stack(cols, axis=3)                             # (N,H,W,9,C)
    return patches.reshape(n, h * w, 9 * c)


@jax.jit
def simclr_forward(x_nchw, params):
    n, c, h, w = x_nchw.shape
    hw = h * w
    k = 9 * c
    x_nhwc = jnp.transpose(x_nchw, (0, 2, 3, 1))
    # bf16, UNPADDED patches: the K=9C -> 128 zero-pad happens on-chip in the
    # kernel, cutting the dominant HBM input ~3.6x vs. a pre-padded layout.
    patches = im2col_3x3_same(x_nhwc).reshape(n * hw, k).astype(jnp.bfloat16)
    # TODO(synk): for larger images, skip the host-side im2col entirely and do
    # the 3x3 tap expansion in-kernel from the raw NHWC tile (another ~9x HBM cut).

    kp = max(128, ((k + 127) // 128) * 128)
    conv_w = jnp.pad(params["conv_w"], ((0, kp - k), (0, 0))).astype(jnp.bfloat16)
    w1 = params["w1"].astype(jnp.bfloat16)   # bf16 MXU operands, f32 accumulation
    w2 = params["w2"].astype(jnp.bfloat16)

    out_dim = params["w2"].shape[1]
    vmem = pl.BlockSpec(memory_space=pltpu.MemorySpace.VMEM)
    return pl.pallas_call(
        simclr_kernel,
        out_shape=jax.ShapeDtypeStruct((n, out_dim), jnp.float32),
        in_specs=[vmem] * 9,
        out_specs=vmem,
    )(patches, conv_w, params["conv_b"], w1, params["b1"],
      params["gamma"], params["beta"], w2, params["b2"])


# ------------------------------ pure-JAX reference --------------------------- #
def simclr_reference(x_nchw, params):
    """f32 reference matching the PyTorch module's forward semantics."""
    x_nhwc = jnp.transpose(x_nchw, (0, 2, 3, 1))
    patches = im2col_3x3_same(x_nhwc)                             # (N, HW, 9C)
    y = jnp.einsum("npk,kf->npf", patches, params["conv_w"]) + params["conv_b"]
    y = jnp.maximum(y, 0.0)
    h = jnp.mean(y, axis=1)                                       # global avg pool -> (N, F)
    y1 = h @ params["w1"] + params["b1"]
    mu = jnp.mean(y1, axis=0, keepdims=True)
    var = jnp.mean((y1 - mu) ** 2, axis=0, keepdims=True)
    y1 = (y1 - mu) / jnp.sqrt(var + 1e-5) * params["gamma"] + params["beta"]
    y1 = jnp.maximum(y1, 0.0)
    z = y1 @ params["w2"] + params["b2"]
    nrm = jnp.sqrt(jnp.sum(z * z, axis=1, keepdims=True))
    return z / jnp.maximum(nrm, 1e-12)


def init_params(key, c_in, feat, out_dim):
    ks = jax.random.split(key, 6)
    k9c = 9 * c_in
    return {
        "conv_w": jax.random.normal(ks[0], (k9c, feat), jnp.float32) / jnp.sqrt(k9c),
        "conv_b": 0.01 * jax.random.normal(ks[1], (1, feat), jnp.float32),
        "w1": jax.random.normal(ks[2], (feat, feat), jnp.float32) / jnp.sqrt(feat),
        "b1": 0.01 * jax.random.normal(ks[3], (1, feat), jnp.float32),
        "gamma": jnp.ones((1, feat), jnp.float32),    # BatchNorm1d default affine init
        "beta": jnp.zeros((1, feat), jnp.float32),
        "w2": jax.random.normal(ks[4], (feat, out_dim), jnp.float32) / jnp.sqrt(feat),
        "b2": 0.01 * jax.random.normal(ks[5], (1, out_dim), jnp.float32),
    }
    # TODO(synk): BatchNorm1d running-stats update (a training-mode side effect)
    # is not materialized; only the forward batch-stat normalization is implemented.


if __name__ == "__main__":
    key = jax.random.PRNGKey(0)
    k_x, k_p = jax.random.split(key)

    N, C, H, W = 8, 4, 16, 16          # small NCHW input, like the PyTorch module
    FEAT, OUT_DIM = 128, 128           # encoder in_feats / SimCLR out_dim

    x = jax.random.normal(k_x, (N, C, H, W), jnp.float32)
    # Per-sample scale so BatchNorm1d's batch statistics are well conditioned
    # (globally averaging i.i.d. noise would make the batch variance tiny and
    # amplify bf16 rounding in the comparison below).
    x = x * jnp.linspace(0.5, 2.0, N, dtype=jnp.float32).reshape(N, 1, 1, 1)
    params = init_params(k_p, C, FEAT, OUT_DIM)

    z = jax.block_until_ready(simclr_forward(x, params))
    z_ref = jax.block_until_ready(simclr_reference(x, params))

    assert z.shape == (N, OUT_DIM)
    assert jnp.allclose(jnp.linalg.norm(z, axis=1), 1.0, atol=1e-4)
    # bf16 MXU operands on the encoder and both projector matmuls (f32 accum)
    # vs the pure-f32 reference => loose tolerance.
    assert jnp.allclose(z, z_ref, atol=5e-2, rtol=5e-2)
    print("KERNEL_OK")
</pallas_src>

<mosaic_0001>
module attributes {stable_mosaic.version = 11 : i64} {
  func.func @simclr_kernel(%arg0: memref<2048x36xbf16, #tpu.memory_space<vmem>>, %arg1: memref<128x128xbf16, #tpu.memory_space<vmem>>, %arg2: memref<1x128xf32, #tpu.memory_space<vmem>>, %arg3: memref<128x128xbf16, #tpu.memory_space<vmem>>, %arg4: memref<1x128xf32, #tpu.memory_space<vmem>>, %arg5: memref<1x128xf32, #tpu.memory_space<vmem>>, %arg6: memref<1x128xf32, #tpu.memory_space<vmem>>, %arg7: memref<128x128xbf16, #tpu.memory_space<vmem>>, %arg8: memref<1x128xf32, #tpu.memory_space<vmem>>, %arg9: memref<8x128xf32, #tpu.memory_space<vmem>>) attributes {dimension_semantics = [], scalar_prefetch = 0 : i64, scratch_operands = 0 : i64, tpu.core_type = #tpu.core_type<tc>} {
    %c0 = arith.constant 0 : index
    %c0_0 = arith.constant 0 : index
    %0 = vector.load %arg0[%c0, %c0_0] : memref<2048x36xbf16, #tpu.memory_space<vmem>>, vector<2048x36xbf16>
    %cst = arith.constant 0.000000e+00 : bf16
    %1 = vector.broadcast %cst : bf16 to vector<2048x92xbf16>
    %2 = tpu.concatenate %0, %1 in 1 : vector<2048x36xbf16>, vector<2048x92xbf16> -> vector<2048x128xbf16>
    %c0_1 = arith.constant 0 : index
    %c0_2 = arith.constant 0 : index
    %3 = vector.load %arg1[%c0_1, %c0_2] : memref<128x128xbf16, #tpu.memory_space<vmem>>, vector<128x128xbf16>
    %cst_3 = arith.constant dense<0.000000e+00> : vector<2048x128xf32>
    %4 = tpu.matmul %2, %3, %cst_3 {dimension_numbers = #tpu.dot_dimension_numbers<[1], [0], [0], [1], [0, 0, 1, 1], [], []>} : vector<2048x128xbf16>, vector<128x128xbf16>, vector<2048x128xf32> -> vector<2048x128xf32>
    %c0_4 = arith.constant 0 : index
    %c0_5 = arith.constant 0 : index
    %5 = vector.load %arg2[%c0_4, %c0_5] : memref<1x128xf32, #tpu.memory_space<vmem>>, vector<1x128xf32>
    %6 = vector.broadcast %5 : vector<1x128xf32> to vector<2048x128xf32>
    %7 = arith.addf %4, %6 : vector<2048x128xf32>
    %cst_6 = arith.constant 0.000000e+00 : f32
    %8 = vector.broadcast %cst_6 : f32 to vector<2048x128xf32>
    %9 = arith.maximumf %7, %8 : vector<2048x128xf32>
    %10 = vector.shape_cast %9 : vector<2048x128xf32> to vector<8x256x128xf32>
    %cst_7 = arith.constant dense<0.000000e+00> : vector<8x128xf32>
    %11 = vector.multi_reduction <add>, %10, %cst_7 [1] : vector<8x256x128xf32> to vector<8x128xf32>
    %cst_8 = arith.constant 3.906250e-03 : f32
    %12 = vector.broadcast %cst_8 : f32 to vector<8x128xf32>
    %13 = arith.mulf %11, %12 : vector<8x128xf32>
    %14 = arith.truncf %13 : vector<8x128xf32> to vector<8x128xbf16>
    %c0_9 = arith.constant 0 : index
    %c0_10 = arith.constant 0 : index
    %15 = vector.load %arg3[%c0_9, %c0_10] : memref<128x128xbf16, #tpu.memory_space<vmem>>, vector<128x128xbf16>
    %cst_11 = arith.constant dense<0.000000e+00> : vector<8x128xf32>
    %16 = tpu.matmul %14, %15, %cst_11 {dimension_numbers = #tpu.dot_dimension_numbers<[1], [0], [0], [1], [0, 0, 1, 1], [], []>} : vector<8x128xbf16>, vector<128x128xbf16>, vector<8x128xf32> -> vector<8x128xf32>
    %c0_12 = arith.constant 0 : index
    %c0_13 = arith.constant 0 : index
    %17 = vector.load %arg4[%c0_12, %c0_13] : memref<1x128xf32, #tpu.memory_space<vmem>>, vector<1x128xf32>
    %18 = vector.broadcast %17 : vector<1x128xf32> to vector<8x128xf32>
    %19 = arith.addf %16, %18 : vector<8x128xf32>
    %cst_14 = arith.constant dense<0.000000e+00> : vector<128xf32>
    %20 = vector.multi_reduction <add>, %19, %cst_14 [0] : vector<8x128xf32> to vector<128xf32>
    %21 = vector.shape_cast %20 : vector<128xf32> to vector<1x128xf32>
    %cst_15 = arith.constant 8.000000e+00 : f32
    %22 = vector.broadcast %cst_15 : f32 to vector<1x128xf32>
    %23 = arith.divf %21, %22 : vector<1x128xf32>
    %24 = vector.broadcast %23 : vector<1x128xf32> to vector<8x128xf32>
    %25 = arith.subf %19, %24 : vector<8x128xf32>
    %26 = arith.mulf %25, %25 : vector<8x128xf32>
    %cst_16 = arith.constant dense<0.000000e+00> : vector<128xf32>
    %27 = vector.multi_reduction <add>, %26, %cst_16 [0] : vector<8x128xf32> to vector<128xf32>
    %28 = vector.shape_cast %27 : vector<128xf32> to vector<1x128xf32>
    %cst_17 = arith.constant 8.000000e+00 : f32
    %29 = vector.broadcast %cst_17 : f32 to vector<1x128xf32>
    %30 = arith.divf %28, %29 : vector<1x128xf32>
    %31 = vector.broadcast %23 : vector<1x128xf32> to vector<8x128xf32>
    %32 = arith.subf %19, %31 : vector<8x128xf32>
    %cst_18 = arith.constant 9.99999974E-6 : f32
    %33 = vector.broadcast %cst_18 : f32 to vector<1x128xf32>
    %34 = arith.addf %30, %33 : vector<1x128xf32>
    %35 = math.rsqrt %34 : vector<1x128xf32>
    %36 = vector.broadcast %35 : vector<1x128xf32> to vector<8x128xf32>
    %37 = arith.mulf %32, %36 : vector<8x128xf32>
    %c0_19 = arith.constant 0 : index
    %c0_20 = arith.constant 0 : index
    %38 = vector.load %arg5[%c0_19, %c0_20] : memref<1x128xf32, #tpu.memory_space<vmem>>, vector<1x128xf32>
    %39 = vector.broadcast %38 : vector<1x128xf32> to vector<8x128xf32>
    %40 = arith.mulf %37, %39 : vector<8x128xf32>
    %c0_21 = arith.constant 0 : index
    %c0_22 = arith.constant 0 : index
    %41 = vector.load %arg6[%c0_21, %c0_22] : memref<1x128xf32, #tpu.memory_space<vmem>>, vector<1x128xf32>
    %42 = vector.broadcast %41 : vector<1x128xf32> to vector<8x128xf32>
    %43 = arith.addf %40, %42 : vector<8x128xf32>
    %cst_23 = arith.constant 0.000000e+00 : f32
    %44 = vector.broadcast %cst_23 : f32 to vector<8x128xf32>
    %45 = arith.maximumf %43, %44 : vector<8x128xf32>
    %46 = arith.truncf %45 : vector<8x128xf32> to vector<8x128xbf16>
    %c0_24 = arith.constant 0 : index
    %c0_25 = arith.constant 0 : index
    %47 = vector.load %arg7[%c0_24, %c0_25] : memref<128x128xbf16, #tpu.memory_space<vmem>>, vector<128x128xbf16>
    %cst_26 = arith.constant dense<0.000000e+00> : vector<8x128xf32>
    %48 = tpu.matmul %46, %47, %cst_26 {dimension_numbers = #tpu.dot_dimension_numbers<[1], [0], [0], [1], [0, 0, 1, 1], [], []>} : vector<8x128xbf16>, vector<128x128xbf16>, vector<8x128xf32> -> vector<8x128xf32>
    %c0_27 = arith.constant 0 : index
    %c0_28 = arith.constant 0 : index
    %49 = vector.load %arg8[%c0_27, %c0_28] : memref<1x128xf32, #tpu.memory_space<vmem>>, vector<1x128xf32>
    %50 = vector.broadcast %49 : vector<1x128xf32> to vector<8x128xf32>
    %51 = arith.addf %48, %50 : vector<8x128xf32>
    %52 = arith.mulf %51, %51 : vector<8x128xf32>
    %cst_29 = arith.constant dense<0.000000e+00> : vector<8xf32>
    %53 = vector.multi_reduction <add>, %52, %cst_29 [1] : vector<8x128xf32> to vector<8xf32>
    %54 = vector.shape_cast %53 : vector<8xf32> to vector<8x1xf32>
    %cst_30 = arith.constant 1.000000e-24 : f32
    %55 = vector.broadcast %cst_30 : f32 to vector<8x1xf32>
    %56 = arith.maximumf %54, %55 : vector<8x1xf32>
    %57 = math.rsqrt %56 : vector<8x1xf32>
    %58 = vector.broadcast %57 : vector<8x1xf32> to vector<8x128xf32>
    %59 = arith.mulf %51, %58 : vector<8x128xf32>
    %c0_31 = arith.constant 0 : index
    %c0_32 = arith.constant 0 : index
    %60 = vector.load %arg9[%c0_31, %c0_32] : memref<8x128xf32, #tpu.memory_space<vmem>>, vector<8x128xf32>
    tpu.vector_store %arg9[%c0_31, %c0_32], %59 {strides = array<i32>} : memref<8x128xf32, #tpu.memory_space<vmem>>, vector<8x128xf32>,
    return
  }
}

</mosaic_0001>

<bundles_post_ra>
// kernel: simclr_forward.1
= control target key start
LH: loop header
LB: loop body
LE: loop exit
PB: predicated region body
PF: predicated region fallthrough
CT: control target
= control target key end

     0   :  { %vm930_vm0 = vcmask 293888   ;;  %s5316_s0 = inlined_call_operand.vmem [shape: bf16[2048,36], index: 0, kind: input, shape index: {}]   ;;  %s5317_s1 = inlined_call_operand.vmem [shape: bf16[128,128], index: 1, kind: input, shape index: {}]   ;;  %s5318_s2 = inlined_call_operand.vmem [shape: f32[1,128], index: 2, kind: input, shape index: {}]   ;;  %s5319_s3 = inlined_call_operand.vmem [shape: bf16[128,128], index: 3, kind: input, shape index: {}]   ;;  %s5320_s4 = inlined_call_operand.vmem [shape: f32[1,128], index: 4, kind: input, shape index: {}]   ;;  %s5321_s5 = inlined_call_operand.vmem [shape: f32[1,128], index: 5, kind: input, shape index: {}]   ;;  %s5322_s6 = inlined_call_operand.vmem [shape: f32[1,128], index: 6, kind: input, shape index: {}]   ;;  %s5323_s7 = inlined_call_operand.vmem [shape: bf16[128,128], index: 7, kind: input, shape index: {}]   ;;  %s5324_s8 = inlined_call_operand.vmem [shape: f32[1,128], index: 8, kind: input, shape index: {}]   ;;  %s5325_s9 = inlined_call_operand.hbm [shape: f32[8,128], index: 9, kind: output, shape index: {}]  }
   0x1   :  { %v4095_v0 = vld [vmem:[%s5317_s1] sm:$0xff]   ;;  %v4096_v1 = vld [vmem:[%s5317_s1 + $0x8] sm:$0xff]   ;;  %v4097_v2 = vld [vmem:[%s5317_s1 + $0x10] sm:$0xff]  }
   0x2   :  { %3764 = vmatprep.subr.bf16.mxu0 %v4095_v0  ;;  %4076 = vmatprep.subr.bf16.mxu1 %v4095_v0  ;;  %v4098_v3 = vld [vmem:[%s5317_s1 + $0x18] sm:$0xff]   ;;  %v4103_v4 = vld [vmem:[%s5316_s0] sm:$0xff]   ;;  %v4100_v6 = vld [vmem:[%s5317_s1 + $0x28] sm:$0xff]  }
   0x3   :  { %3765 = vmatpush3.bf16.msra.mxu0 %v4095_v0  ;;  %4084 = vmatpush3.bf16.msra.mxu1 %v4095_v0  ;;  %v4099_v5 = vld [vmem:[%s5317_s1 + $0x20] sm:$0xff]   ;;  %v4101_v7 = vld [vmem:[%s5317_s1 + $0x30] sm:$0xff]   ;;  %v4102_v8 = vld [vmem:[%s5317_s1 + $0x38] sm:$0xff]  }
   0x4   :  { %3766 = vmatprep.subr.bf16.mxu0 %v4096_v1  ;;  %4077 = vmatprep.subr.bf16.mxu1 %v4096_v1  ;;  %v4123_v9 = vld [vmem:[%s5316_s0 + $0x230] sm:$0xff]   ;;  %v4104_v10 = vld [vmem:[%s5316_s0 + $0x8] sm:$0xff]   ;;  %v4124_v11 = vld [vmem:[%s5316_s0 + $0x238] sm:$0xff]  }
   0x5   :  { %3780 = vmatprep.mubr.msk.bf16.mxu0 %vm930_vm0, %v4103_v4  ;;  %3920 = vmatprep.mubr.msk.bf16.mxu1 %vm930_vm0, %v4123_v9  ;;  %v4105_v12 = vld [vmem:[%s5316_s0 + $0x10] sm:$0xff]   ;;  %v4127_v13 = vld [vmem:[%s5316_s0 + $0x240] sm:$0xff]   ;;  %v4106_v14 = vld [vmem:[%s5316_s0 + $0x18] sm:$0xff]  }
   0x6   :  { %v4107_v15 = vld [vmem:[%s5316_s0 + $0x20] sm:$0xff]   ;;  %v4128_v16 = vld [vmem:[%s5316_s0 + $0x248] sm:$0xff]   ;;  %v4131_v17 = vld [vmem:[%s5316_s0 + $0x250] sm:$0xff]  }
   0x7   :  { %3767 = vmatpush3.bf16.msra.mxu0 %v4096_v1  ;;  %4085 = vmatpush3.bf16.msra.mxu1 %v4096_v1  ;;  %v4108_v18 = vld [vmem:[%s5316_s0 + $0x28] sm:$0xff]   ;;  %v4109_v19 = vld [vmem:[%s5316_s0 + $0x30] sm:$0xff]   ;;  %v4132_v20 = vld [vmem:[%s5316_s0 + $0x258] sm:$0xff]  }
   0x8   :  { %3768 = vmatprep.subr.bf16.mxu0 %v4097_v2  ;;  %4078 = vmatprep.subr.bf16.mxu1 %v4097_v2  ;;  %v4135_v21 = vld [vmem:[%s5316_s0 + $0x260] sm:$0xff]   ;;  %v4110_v22 = vld [vmem:[%s5316_s0 + $0x38] sm:$0xff]   ;;  %v4136_v24 = vld [vmem:[%s5316_s0 + $0x268] sm:$0xff]  }
   0x9   :  { %v4111_v23 = vld [vmem:[%s5316_s0 + $0x40] sm:$0xff]   ;;  %v4139_v25 = vld [vmem:[%s5316_s0 + $0x270] sm:$0xff]   ;;  %v4112_v26 = vld [vmem:[%s5316_s0 + $0x48] sm:$0xff]  }
   0xa   :  { %v4113_v27 = vld [vmem:[%s5316_s0 + $0x50] sm:$0xff]   ;;  %v4140_v28 = vld [vmem:[%s5316_s0 + $0x278] sm:$0xff]   ;;  %v4143_v29 = vld [vmem:[%s5316_s0 + $0x280] sm:$0xff]  }
   0xb   :  { %3769 = vmatpush3.bf16.msra.mxu0 %v4097_v2  ;;  %4086 = vmatpush3.bf16.msra.mxu1 %v4097_v2  ;;  %v4114_v30 = vld [vmem:[%s5316_s0 + $0x58] sm:$0xff]   ;;  %v4115_v31 = vld [vmem:[%s5316_s0 + $0x60] sm:$0xff]   ;;  %v4144_v32 = vld [vmem:[%s5316_s0 + $0x288] sm:$0xff]  }
   0xc   :  { %3770 = vmatprep.subr.bf16.mxu0 %v4098_v3  ;;  %4079 = vmatprep.subr.bf16.mxu1 %v4098_v3  ;;  %v4147_v33 = vld [vmem:[%s5316_s0 + $0x290] sm:$0xff]   ;;  %v4116_v34 = vld [vmem:[%s5316_s0 + $0x68] sm:$0xff]   ;;  %v4148_v36 = vld [vmem:[%s5316_s0 + $0x298] sm:$0xff]  }
   0xd   :  { %v4117_v35 = vld [vmem:[%s5316_s0 + $0x70] sm:$0xff]   ;;  %v4151_v37 = vld [vmem:[%s5316_s0 + $0x2a0] sm:$0xff]   ;;  %v4118_v38 = vld [vmem:[%s5316_s0 + $0x78] sm:$0xff]  }
   0xe   :  { %v4152_v39 = vld [vmem:[%s5316_s0 + $0x2a8] sm:$0xff]   ;;  %v4119_v40 = vld [vmem:[%s5316_s0 + $0x80] sm:$0xff]   ;;  %v4155_v41 = vld [vmem:[%s5316_s0 + $0x2b0] sm:$0xff]  }
   0xf   :  { %3771 = vmatpush3.bf16.msra.mxu0 %v4098_v3  ;;  %4087 = vmatpush3.bf16.msra.mxu1 %v4098_v3  ;;  %v4120_v42 = vld [vmem:[%s5316_s0 + $0x88] sm:$0xff]   ;;  %v4156_v43 = vld [vmem:[%s5316_s0 + $0x2b8] sm:$0xff]   ;;  %v4121_v44 = vld [vmem:[%s5316_s0 + $0x90] sm:$0xff]  }
  0x10   :  { %3772 = vmatprep.subr.bf16.mxu0 %v4099_v5  ;;  %4080 = vmatprep.subr.bf16.mxu1 %v4099_v5  ;;  %v4159_v45 = vld [vmem:[%s5316_s0 + $0x2c0] sm:$0xff]   ;;  %v4122_v46 = vld [vmem:[%s5316_s0 + $0x98] sm:$0xff]   ;;  %v4160_v47 = vld [vmem:[%s5316_s0 + $0x2c8] sm:$0xff]  }
  0x11   :  { %v4125_v48 = vld [vmem:[%s5316_s0 + $0xa0] sm:$0xff]   ;;  %v4163_v49 = vld [vmem:[%s5316_s0 + $0x2d0] sm:$0xff]   ;;  %v4126_v50 = vld [vmem:[%s5316_s0 + $0xa8] sm:$0xff]  }
  0x12   :  { %v4164_v51 = vld [vmem:[%s5316_s0 + $0x2d8] sm:$0xff]   ;;  %v4129_v52 = vld [vmem:[%s5316_s0 + $0xb0] sm:$0xff]   ;;  %v4167_v53 = vld [vmem:[%s5316_s0 + $0x2e0] sm:$0xff]  }
  0x13   :  { %3773 = vmatpush3.bf16.msra.mxu0 %v4099_v5  ;;  %4088 = vmatpush3.bf16.msra.mxu1 %v4099_v5  ;;  %v4130_v54 = vld [vmem:[%s5316_s0 + $0xb8] sm:$0xff]   ;;  %v4133_v55 = vld [vmem:[%s5316_s0 + $0xc0] sm:$0xff]   ;;  %v4168_v56 = vld [vmem:[%s5316_s0 + $0x2e8] sm:$0xff]  }
  0x14   :  { %3774 = vmatprep.subr.bf16.mxu0 %v4100_v6  ;;  %4081 = vmatprep.subr.bf16.mxu1 %v4100_v6  ;;  %v4171_v57 = vld [vmem:[%s5316_s0 + $0x2f0] sm:$0xff]   ;;  %v4134_v58 = vld [vmem:[%s5316_s0 + $0xc8] sm:$0xff]   ;;  %v4172_v60 = vld [vmem:[%s5316_s0 + $0x2f8] sm:$0xff]  }
  0x15   :  { %v4137_v59 = vld [vmem:[%s5316_s0 + $0xd0] sm:$0xff]   ;;  %v4175_v61 = vld [vmem:[%s5316_s0 + $0x300] sm:$0xff]   ;;  %v4138_v62 = vld [vmem:[%s5316_s0 + $0xd8] sm:$0xff]  }
  0x16   :  { %v4141_v63 = vld [vmem:[%s5316_s0 + $0xe0] sm:$0xff]   ;;  %v4176_v0 = vld [vmem:[%s5316_s0 + $0x308] sm:$0xff]   ;;  %v4179_v1 = vld [vmem:[%s5316_s0 + $0x310] sm:$0xff]  }
  0x17   :  { %3775 = vmatpush3.bf16.msra.mxu0 %v4100_v6  ;;  %4089 = vmatpush3.bf16.msra.mxu1 %v4100_v6 }
  0x18   :  { %3776 = vmatprep.subr.bf16.mxu0 %v4101_v7  ;;  %4082 = vmatprep.subr.bf16.mxu1 %v4101_v7 }
  0x1b   :  { %3777 = vmatpush3.bf16.msra.mxu0 %v4101_v7  ;;  %4090 = vmatpush3.bf16.msra.mxu1 %v4101_v7 }
  0x1c   :  { %3778 = vmatprep.subr.bf16.mxu0 %v4102_v8  ;;  %4083 = vmatprep.subr.bf16.mxu1 %v4102_v8 }
  0x1f   :  { %3779 = vmatpush3.bf16.msra.mxu0 %v4102_v8  ;;  %4091 = vmatpush3.bf16.msra.mxu1 %v4102_v8 }
  0x22   :  { %3781 = vmatmul.mubr.msk.bf16.vlgmr.msra.gmra.mrb[0].mxu0 %vm930_vm0, %v4104_v10  ;;  %3921 = vmatmul.mubr.msk.bf16.vlgmr.msra.gmra.mrb[0].mxu1 %vm930_vm0, %v4124_v11 }
  0x23   :  { %3784 = vmatprep.mubr.msk.bf16.mxu0 %vm930_vm0, %v4105_v12  ;;  %3924 = vmatprep.mubr.msk.bf16.mxu1 %vm930_vm0, %v4127_v13 }
  0x2a   :  { %3785 = vmatmul.mubr.msk.bf16.gmra.mrb[4].mxu0 %vm930_vm0, %v4106_v14  ;;  %3925 = vmatmul.mubr.msk.bf16.gmra.mrb[4].mxu1 %vm930_vm0, %v4128_v16 }
  0x2b   :  { %3788 = vmatprep.mubr.msk.bf16.mxu0 %vm930_vm0, %v4107_v15  ;;  %3928 = vmatprep.mubr.msk.bf16.mxu1 %vm930_vm0, %v4131_v17 }
  0x32   :  { %3789 = vmatmul.mubr.msk.bf16.gmra.mrb[8].mxu0 %vm930_vm0, %v4108_v18  ;;  %3929 = vmatmul.mubr.msk.bf16.gmra.mrb[8].mxu1 %vm930_vm0, %v4132_v20 }
  0x33   :  { %3792 = vmatprep.mubr.msk.bf16.mxu0 %vm930_vm0, %v4109_v19  ;;  %3932 = vmatprep.mubr.msk.bf16.mxu1 %vm930_vm0, %v4135_v21 }
  0x3a   :  { %3793 = vmatmul.mubr.msk.bf16.gmra.mrb[12].mxu0 %vm930_vm0, %v4110_v22  ;;  %3933 = vmatmul.mubr.msk.bf16.gmra.mrb[12].mxu1 %vm930_vm0, %v4136_v24 }
  0x3b   :  { %3796 = vmatprep.mubr.msk.bf16.mxu0 %vm930_vm0, %v4111_v23  ;;  %3936 = vmatprep.mubr.msk.bf16.mxu1 %vm930_vm0, %v4139_v25 }
  0x42   :  { %3797 = vmatmul.mubr.msk.bf16.gmra.mrb[16].mxu0 %vm930_vm0, %v4112_v26  ;;  %3937 = vmatmul.mubr.msk.bf16.gmra.mrb[16].mxu1 %vm930_vm0, %v4140_v28 }
  0x43   :  { %3800 = vmatprep.mubr.msk.bf16.mxu0 %vm930_vm0, %v4113_v27  ;;  %3940 = vmatprep.mubr.msk.bf16.mxu1 %vm930_vm0, %v4143_v29 }
  0x4a   :  { %3801 = vmatmul.mubr.msk.bf16.gmra.mrb[20].mxu0 %vm930_vm0, %v4114_v30  ;;  %3941 = vmatmul.mubr.msk.bf16.gmra.mrb[20].mxu1 %vm930_vm0, %v4144_v32 }
  0x4b   :  { %3804 = vmatprep.mubr.msk.bf16.mxu0 %vm930_vm0, %v4115_v31  ;;  %3944 = vmatprep.mubr.msk.bf16.mxu1 %vm930_vm0, %v4147_v33 }
  0x52   :  { %3805 = vmatmul.mubr.msk.bf16.gmra.mrb[24].mxu0 %vm930_vm0, %v4116_v34  ;;  %3945 = vmatmul.mubr.msk.bf16.gmra.mrb[24].mxu1 %vm930_vm0, %v4148_v36 }
  0x53   :  { %3808 = vmatprep.mubr.msk.bf16.mxu0 %vm930_vm0, %v4117_v35  ;;  %3948 = vmatprep.mubr.msk.bf16.mxu1 %vm930_vm0, %v4151_v37 }
  0x5a   :  { %3809 = vmatmul.mubr.msk.bf16.gmra.mrb[28].mxu0 %vm930_vm0, %v4118_v38  ;;  %3949 = vmatmul.mubr.msk.bf16.gmra.mrb[28].mxu1 %vm930_vm0, %v4152_v39 }
  0x5b   :  { %3812 = vmatprep.mubr.msk.bf16.mxu0 %vm930_vm0, %v4119_v40  ;;  %3952 = vmatprep.mubr.msk.bf16.mxu1 %vm930_vm0, %v4155_v41 }
  0x62   :  { %3813 = vmatmul.mubr.msk.bf16.gmra.mrb[32].mxu0 %vm930_vm0, %v4120_v42  ;;  %3953 = vmatmul.mubr.msk.bf16.gmra.mrb[32].mxu1 %vm930_vm0, %v4156_v43 }
  0x63   :  { %3816 = vmatprep.mubr.msk.bf16.mxu0 %vm930_vm0, %v4121_v44  ;;  %3956 = vmatprep.mubr.msk.bf16.mxu1 %vm930_vm0, %v4159_v45 }
  0x6a   :  { %3817 = vmatmul.mubr.msk.bf16.gmra.mrb[36].mxu0 %vm930_vm0, %v4122_v46  ;;  %3957 = vmatmul.mubr.msk.bf16.gmra.mrb[36].mxu1 %vm930_vm0, %v4160_v47 }
  0x6b   :  { %3820 = vmatprep.mubr.msk.bf16.mxu0 %vm930_vm0, %v4125_v48  ;;  %3960 = vmatprep.mubr.msk.bf16.mxu1 %vm930_vm0, %v4163_v49 }
  0x72   :  { %3821 = vmatmul.mubr.msk.bf16.gmra.mrb[40].mxu0 %vm930_vm0, %v4126_v50  ;;  %3961 = vmatmul.mubr.msk.bf16.gmra.mrb[40].mxu1 %vm930_vm0, %v4164_v51 }
  0x73   :  { %3824 = vmatprep.mubr.msk.bf16.mxu0 %vm930_vm0, %v4129_v52  ;;  %3964 = vmatprep.mubr.msk.bf16.mxu1 %vm930_vm0, %v4167_v53 }
  0x7a   :  { %3825 = vmatmul.mubr.msk.bf16.gmra.mrb[44].mxu0 %vm930_vm0, %v4130_v54  ;;  %3965 = vmatmul.mubr.msk.bf16.gmra.mrb[44].mxu1 %vm930_vm0, %v4168_v56 }
  0x7b   :  { %3828 = vmatprep.mubr.msk.bf16.mxu0 %vm930_vm0, %v4133_v55  ;;  %3968 = vmatprep.mubr.msk.bf16.mxu1 %vm930_vm0, %v4171_v57 }
  0x82   :  { %3829 = vmatmul.mubr.msk.bf16.gmra.mrb[48].mxu0 %vm930_vm0, %v4134_v58  ;;  %3969 = vmatmul.mubr.msk.bf16.gmra.mrb[48].mxu1 %vm930_vm0, %v4172_v60 }
  0x83   :  { %3832 = vmatprep.mubr.msk.bf16.mxu0 %vm930_vm0, %v4137_v59  ;;  %3972 = vmatprep.mubr.msk.bf16.mxu1 %vm930_vm0, %v4175_v61 }
  0x84   :  { %14 = vsyncpa [#allocation3], 0  ;;  %v4142_v2 = vld [vmem:[%s5316_s0 + $0xe8] sm:$0xff]   ;;  %v4180_v3 = vld [vmem:[%s5316_s0 + $0x318] sm:$0xff]   ;;  %v4277_v55 = vmov 0.0   ;;  %vm3051_vm1 = vcmask 1041409  }
  0x85   :  { %v4145_v4 = vld [vmem:[%s5316_s0 + $0xf0] sm:$0xff]   ;;  %v4183_v5 = vld [vmem:[%s5316_s0 + $0x320] sm:$0xff]   ;;  %v4146_v6 = vld [vmem:[%s5316_s0 + $0xf8] sm:$0xff]   ;;  %4036 = vmatprep.subr.bf16.mxu1 %v4277_v55  ;;  %vm4278_vm2 = vmmov 0   ;;  %vm3053_vm3 = vcmask 1042434   ;;  %vm3055_vm4 = vcmask 1043459  }
  0x86   :  { %v4184_v7 = vld [vmem:[%s5316_s0 + $0x328] sm:$0xff]   ;;  %v4149_v8 = vld [vmem:[%s5316_s0 + $0x100] sm:$0xff]   ;;  %v4187_v9 = vld [vmem:[%s5316_s0 + $0x330] sm:$0xff]   ;;  %vm3057_vm5 = vcmask 1044484   ;;  %vm3059_vm6 = vcmask 1045509   ;;  %vm3061_vm7 = vcmask 1046534  }
  0x87   :  { %v4150_v10 = vld [vmem:[%s5316_s0 + $0x108] sm:$0xff]   ;;  %v4188_v11 = vld [vmem:[%s5316_s0 + $0x338] sm:$0xff]   ;;  %v4153_v12 = vld [vmem:[%s5316_s0 + $0x110] sm:$0xff]   ;;  %vm3063_vm8 = vcmask 1047559  }
  0x88   :  { %v4191_v13 = vld [vmem:[%s5316_s0 + $0x340] sm:$0xff]   ;;  %v4154_v14 = vld [vmem:[%s5316_s0 + $0x118] sm:$0xff]   ;;  %v4192_v15 = vld [vmem:[%s5316_s0 + $0x348] sm:$0xff]  }
  0x89   :  { %v4157_v16 = vld [vmem:[%s5316_s0 + $0x120] sm:$0xff]   ;;  %v4195_v17 = vld [vmem:[%s5316_s0 + $0x350] sm:$0xff]   ;;  %v4158_v18 = vld [vmem:[%s5316_s0 + $0x128] sm:$0xff]  }
  0x8a   :  { %3833 = vmatmul.mubr.msk.bf16.gmra.mrb[52].mxu0 %vm930_vm0, %v4138_v62  ;;  %3973 = vmatmul.mubr.msk.bf16.gmra.mrb[52].mxu1 %vm930_vm0, %v4176_v0  ;;  %v4196_v19 = vld [vmem:[%s5316_s0 + $0x358] sm:$0xff]   ;;  %v4161_v20 = vld [vmem:[%s5316_s0 + $0x130] sm:$0xff]   ;;  %v4199_v21 = vld [vmem:[%s5316_s0 + $0x360] sm:$0xff]  }
  0x8b   :  { %3836 = vmatprep.mubr.msk.bf16.mxu0 %vm930_vm0, %v4141_v63  ;;  %3976 = vmatprep.mubr.msk.bf16.mxu1 %vm930_vm0, %v4179_v1  ;;  %v4162_v22 = vld [vmem:[%s5316_s0 + $0x138] sm:$0xff]   ;;  %v4200_v23 = vld [vmem:[%s5316_s0 + $0x368] sm:$0xff]   ;;  %v4165_v24 = vld [vmem:[%s5316_s0 + $0x140] sm:$0xff]  }
  0x8c   :  { %v4203_v25 = vld [vmem:[%s5316_s0 + $0x370] sm:$0xff]   ;;  %v4166_v26 = vld [vmem:[%s5316_s0 + $0x148] sm:$0xff]   ;;  %v4204_v27 = vld [vmem:[%s5316_s0 + $0x378] sm:$0xff]  }
  0x8d   :  { %v4169_v28 = vld [vmem:[%s5316_s0 + $0x150] sm:$0xff]   ;;  %v4207_v29 = vld [vmem:[%s5316_s0 + $0x380] sm:$0xff]   ;;  %v4170_v30 = vld [vmem:[%s5316_s0 + $0x158] sm:$0xff]  }
  0x8e   :  { %v4208_v31 = vld [vmem:[%s5316_s0 + $0x388] sm:$0xff]   ;;  %v4173_v32 = vld [vmem:[%s5316_s0 + $0x160] sm:$0xff]   ;;  %v4211_v33 = vld [vmem:[%s5316_s0 + $0x390] sm:$0xff]  }
  0x8f   :  { %v4174_v34 = vld [vmem:[%s5316_s0 + $0x168] sm:$0xff]   ;;  %v4212_v35 = vld [vmem:[%s5316_s0 + $0x398] sm:$0xff]   ;;  %v4177_v36 = vld [vmem:[%s5316_s0 + $0x170] sm:$0xff]  }
  0x90   :  { %v4215_v37 = vld [vmem:[%s5316_s0 + $0x3a0] sm:$0xff]   ;;  %v4178_v38 = vld [vmem:[%s5316_s0 + $0x178] sm:$0xff]   ;;  %v4216_v39 = vld [vmem:[%s5316_s0 + $0x3a8] sm:$0xff]  }
  0x91   :  { %v4181_v40 = vld [vmem:[%s5316_s0 + $0x180] sm:$0xff]   ;;  %v4219_v41 = vld [vmem:[%s5316_s0 + $0x3b0] sm:$0xff]   ;;  %v4182_v42 = vld [vmem:[%s5316_s0 + $0x188] sm:$0xff]  }
  0x92   :  { %3837 = vmatmul.mubr.msk.bf16.gmra.mrb[56].mxu0 %vm930_vm0, %v4142_v2  ;;  %3977 = vmatmul.mubr.msk.bf16.gmra.mrb[56].mxu1 %vm930_vm0, %v4180_v3  ;;  %v4220_v43 = vld [vmem:[%s5316_s0 + $0x3b8] sm:$0xff]   ;;  %v4185_v44 = vld [vmem:[%s5316_s0 + $0x190] sm:$0xff]   ;;  %v4223_v45 = vld [vmem:[%s5316_s0 + $0x3c0] sm:$0xff]  }
  0x93   :  { %3840 = vmatprep.mubr.msk.bf16.mxu0 %vm930_vm0, %v4145_v4  ;;  %3980 = vmatprep.mubr.msk.bf16.mxu1 %vm930_vm0, %v4183_v5  ;;  %v4186_v46 = vld [vmem:[%s5316_s0 + $0x198] sm:$0xff]   ;;  %v4224_v47 = vld [vmem:[%s5316_s0 + $0x3c8] sm:$0xff]   ;;  %v4189_v48 = vld [vmem:[%s5316_s0 + $0x1a0] sm:$0xff]  }
  0x94   :  { %v4225_v49 = vld [vmem:[%s5316_s0 + $0x3d0] sm:$0xff]   ;;  %v4190_v50 = vld [vmem:[%s5316_s0 + $0x1a8] sm:$0xff]   ;;  %v4226_v51 = vld [vmem:[%s5316_s0 + $0x3d8] sm:$0xff]  }
  0x95   :  { %v4193_v52 = vld [vmem:[%s5316_s0 + $0x1b0] sm:$0xff]   ;;  %v4227_v53 = vld [vmem:[%s5316_s0 + $0x3e0] sm:$0xff]   ;;  %v4194_v60 = vld [vmem:[%s5316_s0 + $0x1b8] sm:$0xff]  }
  0x96   :  { %v4231_v54 = vld [vmem:[%s5319_s3] sm:$0xff]   ;;  %v4228_v61 = vld [vmem:[%s5316_s0 + $0x3e8] sm:$0xff]   ;;  %v4229_v3 = vld [vmem:[%s5316_s0 + $0x3f0] sm:$0xff]  }
  0x97   :  { %4037 = vmatpush3.bf16.msra.mxu1 %v4231_v54  ;;  %v4801_v56 = vld [vmem:[%s5318_s2] ss:$0 sm:$0xff] }
  0x98   :  { %4038 = vmatprep.subr.bf16.mxu1 %v4277_v55  ;;  %v4197_v1 = vld [vmem:[%s5316_s0 + $0x1c0] sm:$0xff]  }
  0x9a   :  { %3841 = vmatmul.mubr.msk.bf16.gmra.mrb[60].mxu0 %vm930_vm0, %v4146_v6  ;;  %3981 = vmatmul.mubr.msk.bf16.gmra.mrb[60].mxu1 %vm930_vm0, %v4184_v7 }
  0x9b   :  { %3844 = vmatprep.mubr.msk.bf16.mxu0 %vm930_vm0, %v4149_v8  ;;  %3984 = vmatprep.mubr.msk.bf16.mxu1 %vm930_vm0, %v4187_v9 }
  0xa2   :  { %3845 = vmatmul.mubr.msk.bf16.gmra.mrb[64].mxu0 %vm930_vm0, %v4150_v10  ;;  %3985 = vmatmul.mubr.msk.bf16.gmra.mrb[64].mxu1 %vm930_vm0, %v4188_v11 }
  0xa3   :  { %3848 = vmatprep.mubr.msk.bf16.mxu0 %vm930_vm0, %v4153_v12  ;;  %3988 = vmatprep.mubr.msk.bf16.mxu1 %vm930_vm0, %v4191_v13 }
  0xaa   :  { %3849 = vmatmul.mubr.msk.bf16.gmra.mrb[68].mxu0 %vm930_vm0, %v4154_v14  ;;  %3989 = vmatmul.mubr.msk.bf16.gmra.mrb[68].mxu1 %vm930_vm0, %v4192_v15 }
  0xab   :  { %3852 = vmatprep.mubr.msk.bf16.mxu0 %vm930_vm0, %v4157_v16  ;;  %3992 = vmatprep.mubr.msk.bf16.mxu1 %vm930_vm0, %v4195_v17  ;;  %v4198_v16 = vld [vmem:[%s5316_s0 + $0x1c8] sm:$0xff]   ;;  %v4230_v17 = vld [vmem:[%s5316_s0 + $0x3f8] sm:$0xff]  }
  0xb2   :  { %3853 = vmatmul.mubr.msk.bf16.gmra.mrb[72].mxu0 %vm930_vm0, %v4158_v18  ;;  %3993 = vmatmul.mubr.msk.bf16.gmra.mrb[72].mxu1 %vm930_vm0, %v4196_v19 }
  0xb3   :  { %3856 = vmatprep.mubr.msk.bf16.mxu0 %vm930_vm0, %v4161_v20  ;;  %3996 = vmatprep.mubr.msk.bf16.mxu1 %vm930_vm0, %v4199_v21 }
  0xba   :  { %3857 = vmatmul.mubr.msk.bf16.gmra.mrb[76].mxu0 %vm930_vm0, %v4162_v22  ;;  %3997 = vmatmul.mubr.msk.bf16.gmra.mrb[76].mxu1 %vm930_vm0, %v4200_v23  ;;  %v4201_v23 = vld [vmem:[%s5316_s0 + $0x1d0] sm:$0xff]  }
  0xbb   :  { %3860 = vmatprep.mubr.msk.bf16.mxu0 %vm930_vm0, %v4165_v24  ;;  %4000 = vmatprep.mubr.msk.bf16.mxu1 %vm930_vm0, %v4203_v25 }
  0xc2   :  { %3861 = vmatmul.mubr.msk.bf16.gmra.mrb[80].mxu0 %vm930_vm0, %v4166_v26  ;;  %4001 = vmatmul.mubr.msk.bf16.gmra.mrb[80].mxu1 %vm930_vm0, %v4204_v27 }
  0xc3   :  { %3864 = vmatprep.mubr.msk.bf16.mxu0 %vm930_vm0, %v4169_v28  ;;  %4004 = vmatprep.mubr.msk.bf16.mxu1 %vm930_vm0, %v4207_v29 }
  0xca   :  { %3865 = vmatmul.mubr.msk.bf16.gmra.mrb[84].mxu0 %vm930_vm0, %v4170_v30  ;;  %4005 = vmatmul.mubr.msk.bf16.gmra.mrb[84].mxu1 %vm930_vm0, %v4208_v31 }
  0xcb   :  { %3868 = vmatprep.mubr.msk.bf16.mxu0 %vm930_vm0, %v4173_v32  ;;  %4008 = vmatprep.mubr.msk.bf16.mxu1 %vm930_vm0, %v4211_v33 }
  0xd2   :  { %3869 = vmatmul.mubr.msk.bf16.gmra.mrb[88].mxu0 %vm930_vm0, %v4174_v34  ;;  %4009 = vmatmul.mubr.msk.bf16.gmra.mrb[88].mxu1 %vm930_vm0, %v4212_v35 }
  0xd3   :  { %3872 = vmatprep.mubr.msk.bf16.mxu0 %vm930_vm0, %v4177_v36  ;;  %4012 = vmatprep.mubr.msk.bf16.mxu1 %vm930_vm0, %v4215_v37 }
  0xda   :  { %3873 = vmatmul.mubr.msk.bf16.gmra.mrb[92].mxu0 %vm930_vm0, %v4178_v38  ;;  %4013 = vmatmul.mubr.msk.bf16.gmra.mrb[92].mxu1 %vm930_vm0, %v4216_v39  ;;  %v4202_v39 = vld [vmem:[%s5316_s0 + $0x1d8] sm:$0xff]  }
  0xdb   :  { %3876 = vmatprep.mubr.msk.bf16.mxu0 %vm930_vm0, %v4181_v40  ;;  %4016 = vmatprep.mubr.msk.bf16.mxu1 %vm930_vm0, %v4219_v41 }
  0xe2   :  { %3877 = vmatmul.mubr.msk.bf16.gmra.mrb[96].mxu0 %vm930_vm0, %v4182_v42  ;;  %4017 = vmatmul.mubr.msk.bf16.gmra.mrb[96].mxu1 %vm930_vm0, %v4220_v43 }
  0xe3   :  { %3880 = vmatprep.mubr.msk.bf16.mxu0 %vm930_vm0, %v4185_v44  ;;  %4020 = vmatprep.mubr.msk.bf16.mxu1 %vm930_vm0, %v4223_v45  ;;  %v4205_v45 = vld [vmem:[%s5316_s0 + $0x1e0] sm:$0xff]  }
  0xea   :  { %3881 = vmatmul.mubr.msk.bf16.gmra.mrb[100].mxu0 %vm930_vm0, %v4186_v46  ;;  %4021 = vmatmul.mubr.msk.bf16.gmra.mrb[100].mxu1 %vm930_vm0, %v4224_v47 }
  0xeb   :  { %3884 = vmatprep.mubr.msk.bf16.mxu0 %vm930_vm0, %v4189_v48  ;;  %4024 = vmatprep.mubr.msk.bf16.mxu1 %vm930_vm0, %v4225_v49 }
  0xf2   :  { %3885 = vmatmul.mubr.msk.bf16.gmra.mrb[104].mxu0 %vm930_vm0, %v4190_v50  ;;  %4025 = vmatmul.mubr.msk.bf16.gmra.mrb[104].mxu1 %vm930_vm0, %v4226_v51 }
  0xf3   :  { %3888 = vmatprep.mubr.msk.bf16.mxu0 %vm930_vm0, %v4193_v52  ;;  %4028 = vmatprep.mubr.msk.bf16.mxu1 %vm930_vm0, %v4227_v53 }
  0xf5   :  { %v3782_v57 = vpop.f32.mrb[0].mxu0  ;;  %v4804_v58 = vpop.f32.mrb[0].mxu1 }
  0xf6   :  { %v1421_v59 = vpop.f32.mrb[1].mxu0  ;;  %v4812_v62 = vpop.f32.mrb[1].mxu1  ;;  %v1430_v6 = vadd.f32 %v3782_v57, %v4801_v56 }
  0xf7   :  { %v1422_v63 = vadd.f32 %v4801_v56, %v1421_v59  ;;  %v3783_v0 = vpop.f32.mrb[2].mxu0  ;;  %v4818_v2 = vpop.f32.mrb[2].mxu1 }
  0xf8   :  { %v1424_v4 = vpop.f32.mrb[3].mxu0  ;;  %v4823_v5 = vpop.f32.mrb[3].mxu1  ;;  %v1433_v9 = vadd.f32 %v3783_v0, %v4801_v56  ;;  %v2446_v11 = vmax.f32 %v1430_v6, 0.0 }
  0xf9   :  { %v1425_v7 = vadd.f32 %v4801_v56, %v1424_v4  ;;  %v2444_v8 = vmax.f32 %v1422_v63, 0.0 }
  0xfa   :  { %3889 = vmatmul.mubr.msk.bf16.gmra.mrb[108].mxu0 %vm930_vm0, %v4194_v60  ;;  %4029 = vmatmul.mubr.msk.bf16.gmra.mrb[108].mxu1 %vm930_vm0, %v4228_v61  ;;  %v2447_v19 = vmax.f32 %v1433_v9, 0.0  ;;  %v4209_v9 = vld [vmem:[%s5316_s0 + $0x1f0] sm:$0xff]  }
  0xfb   :  { %v2445_v10 = vmax.f32 %v1425_v7, 0.0  ;;  %3892 = vmatprep.mubr.msk.bf16.mxu0 %vm930_vm0, %v4197_v1  ;;  %4032 = vmatprep.mubr.msk.bf16.mxu1 %vm930_vm0, %v4229_v3  ;;  %v4206_v1 = vld [vmem:[%s5316_s0 + $0x1e8] sm:$0xff]  }
  0xfd   :  { %v2700_v12 = vadd.f32 %v2445_v10, %v2444_v8  ;;  %v3786_v13 = vpop.f32.mrb[4].mxu0  ;;  %v4832_v14 = vpop.f32.mrb[4].mxu1 }
  0xfe   :  { %v1437_v15 = vpop.f32.mrb[5].mxu0  ;;  %v4840_v18 = vpop.f32.mrb[5].mxu1  ;;  %v1446_v27 = vadd.f32 %v3786_v13, %v4801_v56 }
  0xff   :  { %v2701_v20 = vadd.f32 %v2700_v12, %v2446_v11  ;;  %v1438_v21 = vadd.f32 %v4801_v56, %v1437_v15  ;;  %v3787_v22 = vpop.f32.mrb[6].mxu0  ;;  %v4846_v24 = vpop.f32.mrb[6].mxu1  ;;  %v4232_v11 = vld [vmem:[%s5319_s3 + $0x8] sm:$0xff]  }
 0x100   :  { %v1440_v25 = vpop.f32.mrb[7].mxu0  ;;  %v4848_v26 = vpop.f32.mrb[7].mxu1  ;;  %v1449_v32 = vadd.f32 %v3787_v22, %v4801_v56  ;;  %v2450_v34 = vmax.f32 %v1446_v27, 0.0  ;;  %4039 = vmatpush3.bf16.msra.mxu1 %v4232_v11 }
 0x101   :  { %v2448_v28 = vmax.f32 %v1438_v21, 0.0  ;;  %v2702_v29 = vadd.f32 %v2701_v20, %v2447_v19  ;;  %v1441_v30 = vadd.f32 %v4801_v56, %v1440_v25  ;;  %4040 = vmatprep.subr.bf16.mxu1 %v4277_v55 }
 0x102   :  { %3893 = vmatmul.mubr.msk.bf16.gmra.mrb[112].mxu0 %vm930_vm0, %v4198_v16  ;;  %4033 = vmatmul.mubr.msk.bf16.gmra.mrb[112].mxu1 %vm930_vm0, %v4230_v17  ;;  %v2451_v41 = vmax.f32 %v1449_v32, 0.0 }
 0x103   :  { %v2703_v31 = vadd.f32 %v2702_v29, %v2448_v28  ;;  %v2449_v33 = vmax.f32 %v1441_v30, 0.0  ;;  %3896 = vmatprep.mubr.msk.bf16.mxu0 %vm930_vm0, %v4201_v23  ;;  %v4210_v30 = vld [vmem:[%s5316_s0 + $0x1f8] sm:$0xff]   ;;  %4052 = vmatprep.mubr.msk.bf16.mxu1 %vm4278_vm2, %v4277_v55 }
 0x105   :  { %v2704_v35 = vadd.f32 %v2703_v31, %v2449_v33  ;;  %v3790_v36 = vpop.f32.mrb[8].mxu0  ;;  %v4856_v37 = vpop.f32.mrb[8].mxu1 }
 0x106   :  { %v1453_v38 = vpop.f32.mrb[9].mxu0  ;;  %v4861_v40 = vpop.f32.mrb[9].mxu1  ;;  %v1462_v49 = vadd.f32 %v3790_v36, %v4801_v56  ;;  %v4213_v36 = vld [vmem:[%s5316_s0 + $0x200] sm:$0xff]  }
 0x107   :  { %v2705_v42 = vadd.f32 %v2704_v35, %v2450_v34  ;;  %v1454_v43 = vadd.f32 %v4801_v56, %v1453_v38  ;;  %v3791_v44 = vpop.f32.mrb[10].mxu0  ;;  %v4867_v46 = vpop.f32.mrb[10].mxu1 }
 0x108   :  { %v1456_v47 = vpop.f32.mrb[11].mxu0  ;;  %v4869_v48 = vpop.f32.mrb[11].mxu1  ;;  %v1465_v54 = vadd.f32 %v3791_v44, %v4801_v56  ;;  %v2454_v59 = vmax.f32 %v1462_v49, 0.0 }
 0x109   :  { %v2452_v50 = vmax.f32 %v1454_v43, 0.0  ;;  %v2706_v51 = vadd.f32 %v2705_v42, %v2451_v41  ;;  %v1457_v52 = vadd.f32 %v4801_v56, %v1456_v47 }
 0x10a   :  { %3897 = vmatmul.mubr.msk.bf16.gmra.mrb[116].mxu0 %vm930_vm0, %v4202_v39  ;;  %v2455_v4 = vmax.f32 %v1465_v54, 0.0 }
 0x10b   :  { %v2707_v53 = vadd.f32 %v2706_v51, %v2452_v50  ;;  %v2453_v57 = vmax.f32 %v1457_v52, 0.0  ;;  %3900 = vmatprep.mubr.msk.bf16.mxu0 %vm930_vm0, %v4205_v45 }
 0x10d   :  { %v2708_v60 = vadd.f32 %v2707_v53, %v2453_v57  ;;  %v3794_v61 = vpop.f32.mrb[12].mxu0  ;;  %v4876_v63 = vpop.f32.mrb[12].mxu1 }
 0x10e   :  { %v1469_v0 = vpop.f32.mrb[13].mxu0  ;;  %v4881_v3 = vpop.f32.mrb[13].mxu1  ;;  %v1478_v15 = vadd.f32 %v3794_v61, %v4801_v56 }
 0x10f   :  { %v2709_v6 = vadd.f32 %v2708_v60, %v2454_v59  ;;  %v1470_v7 = vadd.f32 %v4801_v56, %v1469_v0  ;;  %v3795_v8 = vpop.f32.mrb[14].mxu0  ;;  %v4887_v10 = vpop.f32.mrb[14].mxu1  ;;  %v4214_v59 = vld [vmem:[%s5316_s0 + $0x208] sm:$0xff]  }
 0x110   :  { %v1472_v12 = vpop.f32.mrb[15].mxu0  ;;  %v4892_v13 = vpop.f32.mrb[15].mxu1  ;;  %v1481_v21 = vadd.f32 %v3795_v8, %v4801_v56  ;;  %v2458_v23 = vmax.f32 %v1478_v15, 0.0 }
 0x111   :  { %v2456_v16 = vmax.f32 %v1470_v7, 0.0  ;;  %v2710_v17 = vadd.f32 %v2709_v6, %v2455_v4  ;;  %v1473_v19 = vadd.f32 %v4801_v56, %v1472_v12  ;;  %v4217_v6 = vld [vmem:[%s5316_s0 + $0x210] sm:$0xff]  }
 0x112   :  { %3901 = vmatmul.mubr.msk.bf16.gmra.mrb[120].mxu0 %vm930_vm0, %v4206_v1  ;;  %v2459_v32 = vmax.f32 %v1481_v21, 0.0 }
 0x113   :  { %v2711_v20 = vadd.f32 %v2710_v17, %v2456_v16  ;;  %v2457_v22 = vmax.f32 %v1473_v19, 0.0  ;;  %3904 = vmatprep.mubr.msk.bf16.mxu0 %vm930_vm0, %v4209_v9 }
 0x115   :  { %v2712_v25 = vadd.f32 %v2711_v20, %v2457_v22  ;;  %v3798_v27 = vpop.f32.mrb[16].mxu0  ;;  %v4900_v28 = vpop.f32.mrb[16].mxu1 }
 0x116   :  { %v1485_v29 = vpop.f32.mrb[17].mxu0  ;;  %v4905_v31 = vpop.f32.mrb[17].mxu1  ;;  %v1494_v42 = vadd.f32 %v3798_v27, %v4801_v56 }
 0x117   :  { %v2713_v33 = vadd.f32 %v2712_v25, %v2458_v23  ;;  %v1486_v34 = vadd.f32 %v4801_v56, %v1485_v29  ;;  %v3799_v35 = vpop.f32.mrb[18].mxu0  ;;  %v4911_v38 = vpop.f32.mrb[18].mxu1 }
 0x118   :  { %v1488_v39 = vpop.f32.mrb[19].mxu0  ;;  %v4913_v41 = vpop.f32.mrb[19].mxu1  ;;  %v1497_v49 = vadd.f32 %v3799_v35, %v4801_v56  ;;  %v2462_v51 = vmax.f32 %v1494_v42, 0.0 }
 0x119   :  { %v2460_v43 = vmax.f32 %v1486_v34, 0.0  ;;  %v2714_v44 = vadd.f32 %v2713_v33, %v2459_v32  ;;  %v1489_v45 = vadd.f32 %v4801_v56, %v1488_v39  ;;  %v4218_v39 = vld [vmem:[%s5316_s0 + $0x218] sm:$0xff]  }
 0x11a   :  { %3905 = vmatmul.mubr.msk.bf16.gmra.mrb[124].mxu0 %vm930_vm0, %v4210_v30  ;;  %v2463_v61 = vmax.f32 %v1497_v49, 0.0 }
 0x11b   :  { %v2715_v47 = vadd.f32 %v2714_v44, %v2460_v43  ;;  %v2461_v50 = vmax.f32 %v1489_v45, 0.0  ;;  %3908 = vmatprep.mubr.msk.bf16.mxu0 %vm930_vm0, %v4213_v36 }
 0x11d   :  { %v2716_v52 = vadd.f32 %v2715_v47, %v2461_v50  ;;  %v3802_v53 = vpop.f32.mrb[20].mxu0  ;;  %v3942_v54 = vpop.f32.mrb[20].mxu1 }
 0x11e   :  { %v1501_v57 = vpop.f32.mrb[21].mxu0  ;;  %v2061_v60 = vpop.f32.mrb[21].mxu1  ;;  %v2070_v11 = vadd.f32 %v3942_v54, %v4801_v56  ;;  %v1510_v15 = vadd.f32 %v3802_v53, %v4801_v56 }
 0x11f   :  { %v2717_v0 = vadd.f32 %v2716_v52, %v2462_v51  ;;  %v1502_v1 = vadd.f32 %v4801_v56, %v1501_v57  ;;  %v3803_v4 = vpop.f32.mrb[22].mxu0  ;;  %v2062_v7 = vadd.f32 %v4801_v56, %v2061_v60  ;;  %v3943_v8 = vpop.f32.mrb[22].mxu1  ;;  %v4221_v51 = vld [vmem:[%s5316_s0 + $0x220] sm:$0xff]  }
 0x120   :  { %v1504_v9 = vpop.f32.mrb[23].mxu0  ;;  %v2064_v12 = vpop.f32.mrb[23].mxu1  ;;  %v2073_v21 = vadd.f32 %v3943_v8, %v4801_v56  ;;  %v1513_v25 = vadd.f32 %v3803_v4, %v4801_v56  ;;  %v2606_v29 = vmax.f32 %v2070_v11, 0.0  ;;  %v2466_v32 = vmax.f32 %v1510_v15, 0.0 }
 0x121   :  { %v2464_v16 = vmax.f32 %v1502_v1, 0.0  ;;  %v2718_v17 = vadd.f32 %v2717_v0, %v2463_v61  ;;  %v1505_v19 = vadd.f32 %v4801_v56, %v1504_v9  ;;  %v2604_v20 = vmax.f32 %v2062_v7, 0.0  ;;  %v4233_v0 = vld [vmem:[%s5319_s3 + $0x10] sm:$0xff]  }
 0x122   :  { %3909 = vmatmul.mubr.msk.bf16.gmra.mrb[128].mxu0 %vm930_vm0, %v4214_v59  ;;  %v2065_v22 = vadd.f32 %v4801_v56, %v2064_v12  ;;  %v2607_v42 = vmax.f32 %v2073_v21, 0.0  ;;  %v2467_v45 = vmax.f32 %v1513_v25, 0.0  ;;  %4041 = vmatpush3.bf16.msra.mxu1 %v4233_v0 }
 0x123   :  { %v2719_v23 = vadd.f32 %v2718_v17, %v2464_v16  ;;  %v2465_v27 = vmax.f32 %v1505_v19, 0.0  ;;  %3912 = vmatprep.mubr.msk.bf16.mxu0 %vm930_vm0, %v4217_v6  ;;  %4042 = vmatprep.subr.bf16.mxu1 %v4277_v55 }
 0x124   :  { %v2605_v30 = vmax.f32 %v2065_v22, 0.0 }
 0x125   :  { %v2720_v33 = vadd.f32 %v2719_v23, %v2465_v27  ;;  %v3806_v34 = vpop.f32.mrb[24].mxu0  ;;  %v3946_v35 = vpop.f32.mrb[24].mxu1 }
 0x126   :  { %v1517_v36 = vpop.f32.mrb[25].mxu0  ;;  %v2885_v43 = vadd.f32 %v2605_v30, %v2604_v20  ;;  %v2077_v44 = vpop.f32.mrb[25].mxu1  ;;  %v1526_v54 = vadd.f32 %v3806_v34, %v4801_v56  ;;  %v2086_v60 = vadd.f32 %v3946_v35, %v4801_v56 }
 0x127   :  { %v2721_v47 = vadd.f32 %v2720_v33, %v2466_v32  ;;  %v1518_v49 = vadd.f32 %v4801_v56, %v1517_v36  ;;  %v3807_v50 = vpop.f32.mrb[26].mxu0  ;;  %v2078_v52 = vadd.f32 %v4801_v56, %v2077_v44  ;;  %v3947_v53 = vpop.f32.mrb[26].mxu1 }
 0x128   :  { %v1520_v57 = vpop.f32.mrb[27].mxu0  ;;  %v2886_v59 = vadd.f32 %v2885_v43, %v2606_v29  ;;  %v2080_v61 = vpop.f32.mrb[27].mxu1  ;;  %v2089_v9 = vadd.f32 %v3947_v53, %v4801_v56  ;;  %v1529_v15 = vadd.f32 %v3807_v50, %v4801_v56  ;;  %v2610_v17 = vmax.f32 %v2086_v60, 0.0  ;;  %v4222_v29 = vld [vmem:[%s5316_s0 + $0x228] sm:$0xff]  }
 0x129   :  { %v2468_v1 = vmax.f32 %v1518_v49, 0.0  ;;  %v2722_v4 = vadd.f32 %v2721_v47, %v2467_v45  ;;  %v1521_v6 = vadd.f32 %v4801_v56, %v1520_v57  ;;  %v2608_v7 = vmax.f32 %v2078_v52, 0.0 }
 0x12a   :  { %3913 = vmatmul.mubr.msk.bf16.gmra.mrb[132].mxu0 %vm930_vm0, %v4218_v39  ;;  %v2887_v8 = vadd.f32 %v2886_v59, %v2607_v42  ;;  %v2081_v11 = vadd.f32 %v4801_v56, %v2080_v61  ;;  %v2470_v21 = vmax.f32 %v1526_v54, 0.0  ;;  %v2611_v30 = vmax.f32 %v2089_v9, 0.0 }
 0x12b   :  { %v2723_v12 = vadd.f32 %v2722_v4, %v2468_v1  ;;  %v2469_v16 = vmax.f32 %v1521_v6, 0.0  ;;  %3916 = vmatprep.mubr.msk.bf16.mxu0 %vm930_vm0, %v4221_v51  ;;  %v2471_v34 = vmax.f32 %v1529_v15, 0.0 }
 0x12c   :  { %v2888_v19 = vadd.f32 %v2887_v8, %v2608_v7  ;;  %v2609_v20 = vmax.f32 %v2081_v11, 0.0 }
 0x12d   :  { %v2724_v22 = vadd.f32 %v2723_v12, %v2469_v16  ;;  %v3810_v23 = vpop.f32.mrb[28].mxu0  ;;  %v3950_v25 = vpop.f32.mrb[28].mxu1 }
 0x12e   :  { %v1533_v27 = vpop.f32.mrb[29].mxu0  ;;  %v2889_v32 = vadd.f32 %v2888_v19, %v2609_v20  ;;  %v2093_v33 = vpop.f32.mrb[29].mxu1  ;;  %v1542_v44 = vadd.f32 %v3810_v23, %v4801_v56  ;;  %v2102_v49 = vadd.f32 %v3950_v25, %v4801_v56 }
 0x12f   :  { %v2725_v35 = vadd.f32 %v2724_v22, %v2470_v21  ;;  %v1534_v36 = vadd.f32 %v4801_v56, %v1533_v27  ;;  %v3811_v39 = vpop.f32.mrb[30].mxu0  ;;  %v2094_v42 = vadd.f32 %v4801_v56, %v2093_v33  ;;  %v3951_v43 = vpop.f32.mrb[30].mxu1 }
 0x130   :  { %v1536_v45 = vpop.f32.mrb[31].mxu0  ;;  %v2890_v47 = vadd.f32 %v2889_v32, %v2610_v17  ;;  %v2096_v50 = vpop.f32.mrb[31].mxu1  ;;  %v2105_v59 = vadd.f32 %v3951_v43, %v4801_v56  ;;  %v1545_v0 = vadd.f32 %v3811_v39, %v4801_v56  ;;  %v2614_v4 = vmax.f32 %v2102_v49, 0.0 }
 0x131   :  { %v2472_v51 = vmax.f32 %v1534_v36, 0.0  ;;  %v2726_v52 = vadd.f32 %v2725_v35, %v2471_v34  ;;  %v1537_v53 = vadd.f32 %v4801_v56, %v1536_v45  ;;  %v2612_v54 = vmax.f32 %v2094_v42, 0.0 }
 0x132   :  { %3917 = vmatmul.mubr.msk.bf16.gmra.mrb[136].mxu0 %vm930_vm0, %v4222_v29  ;;  %v2891_v57 = vadd.f32 %v2890_v47, %v2611_v30  ;;  %v2097_v60 = vadd.f32 %v4801_v56, %v2096_v50  ;;  %v2474_v8 = vmax.f32 %v1542_v44, 0.0  ;;  %v2615_v16 = vmax.f32 %v2105_v59, 0.0 }
 0x133   :  { %v2727_v61 = vadd.f32 %v2726_v52, %v2472_v51  ;;  %v2473_v1 = vmax.f32 %v1537_v53, 0.0  ;;  %v2475_v20 = vmax.f32 %v1545_v0, 0.0 }
 0x134   :  { %v2892_v6 = vadd.f32 %v2891_v57, %v2612_v54  ;;  %v2613_v7 = vmax.f32 %v2097_v60, 0.0 }
 0x135   :  { %v2728_v9 = vadd.f32 %v2727_v61, %v2473_v1  ;;  %v3814_v11 = vpop.f32.mrb[32].mxu0  ;;  %v3954_v12 = vpop.f32.mrb[32].mxu1 }
 0x136   :  { %v1549_v15 = vpop.f32.mrb[33].mxu0  ;;  %v2893_v17 = vadd.f32 %v2892_v6, %v2613_v7  ;;  %v2109_v19 = vpop.f32.mrb[33].mxu1  ;;  %v2118_v32 = vadd.f32 %v3954_v12, %v4801_v56  ;;  %v1558_v35 = vadd.f32 %v3814_v11, %v4801_v56 }
 0x137   :  { %v2729_v21 = vadd.f32 %v2728_v9, %v2474_v8  ;;  %v1550_v22 = vadd.f32 %v4801_v56, %v1549_v15  ;;  %v3815_v23 = vpop.f32.mrb[34].mxu0  ;;  %v2110_v25 = vadd.f32 %v4801_v56, %v2109_v19  ;;  %v3955_v27 = vpop.f32.mrb[34].mxu1 }
 0x138   :  { %v1552_v29 = vpop.f32.mrb[35].mxu0  ;;  %v2894_v30 = vadd.f32 %v2893_v17, %v2614_v4  ;;  %v2112_v33 = vpop.f32.mrb[35].mxu1  ;;  %v2121_v43 = vadd.f32 %v3955_v27, %v4801_v56  ;;  %v1561_v47 = vadd.f32 %v3815_v23, %v4801_v56  ;;  %v2618_v50 = vmax.f32 %v2118_v32, 0.0 }
 0x139   :  { %v4971_v34 = vadd.f32 %v2729_v21, %v2475_v20  ;;  %v1553_v36 = vadd.f32 %v4801_v56, %v1552_v29  ;;  %v2616_v39 = vmax.f32 %v2110_v25, 0.0  ;;  %v2113_v44 = vadd.f32 %v4801_v56, %v2112_v33 }
 0x13a   :  { %v2895_v42 = vadd.f32 %v2894_v30, %v2615_v16  ;;  %v2476_v45 = vmax.f32 %v1550_v22, 0.0  ;;  %v2478_v53 = vmax.f32 %v1558_v35, 0.0  ;;  %v2619_v61 = vmax.f32 %v2121_v43, 0.0 }
 0x13b   :  { %v2477_v49 = vmax.f32 %v1553_v36, 0.0  ;;  %v2617_v52 = vmax.f32 %v2113_v44, 0.0  ;;  %v2479_v4 = vmax.f32 %v1561_v47, 0.0 }
 0x13c   :  { %v2896_v51 = vadd.f32 %v2895_v42, %v2616_v39 }
 0x13d   :  { %v2737_v54 = vadd.f32 %v2477_v49, %v2476_v45  ;;  %v3818_v57 = vpop.f32.mrb[36].mxu0  ;;  %v3958_v59 = vpop.f32.mrb[36].mxu1 }
 0x13e   :  { %v1565_v60 = vpop.f32.mrb[37].mxu0  ;;  %v2897_v0 = vadd.f32 %v2896_v51, %v2617_v52  ;;  %v2125_v1 = vpop.f32.mrb[37].mxu1  ;;  %v1574_v17 = vadd.f32 %v3818_v57, %v4801_v56  ;;  %v2134_v22 = vadd.f32 %v3958_v59, %v4801_v56 }
 0x13f   :  { %v2738_v6 = vadd.f32 %v2737_v54, %v2478_v53  ;;  %v1566_v7 = vadd.f32 %v4801_v56, %v1565_v60  ;;  %v3819_v8 = vpop.f32.mrb[38].mxu0  ;;  %v2126_v9 = vadd.f32 %v4801_v56, %v2125_v1  ;;  %v3959_v11 = vpop.f32.mrb[38].mxu1 }
 0x140   :  { %v1568_v12 = vpop.f32.mrb[39].mxu0  ;;  %v2898_v15 = vadd.f32 %v2897_v0, %v2618_v50  ;;  %v2128_v16 = vpop.f32.mrb[39].mxu1  ;;  %v1577_v29 = vadd.f32 %v3819_v8, %v4801_v56  ;;  %v2137_v35 = vadd.f32 %v3959_v11, %v4801_v56  ;;  %v2482_v36 = vmax.f32 %v1574_v17, 0.0 }
 0x141   :  { %v2480_v19 = vmax.f32 %v1566_v7, 0.0  ;;  %v2739_v20 = vadd.f32 %v2738_v6, %v2479_v4  ;;  %v1569_v21 = vadd.f32 %v4801_v56, %v1568_v12  ;;  %v2620_v23 = vmax.f32 %v2126_v9, 0.0 }
 0x142   :  { %v2899_v25 = vadd.f32 %v2898_v15, %v2619_v61  ;;  %v2129_v32 = vadd.f32 %v4801_v56, %v2128_v16  ;;  %v2622_v47 = vmax.f32 %v2134_v22, 0.0  ;;  %v2483_v50 = vmax.f32 %v1577_v29, 0.0  ;;  %v4234_v29 = vld [vmem:[%s5319_s3 + $0x18] sm:$0xff]  }
 0x143   :  { %v2740_v27 = vadd.f32 %v2739_v20, %v2480_v19  ;;  %v2481_v30 = vmax.f32 %v1569_v21, 0.0  ;;  %v2623_v60 = vmax.f32 %v2137_v35, 0.0  ;;  %4043 = vmatpush3.bf16.msra.mxu1 %v4234_v29 }
 0x144   :  { %v2900_v33 = vadd.f32 %v2899_v25, %v2620_v23  ;;  %v2621_v43 = vmax.f32 %v2129_v32, 0.0  ;;  %4044 = vmatprep.subr.bf16.mxu1 %v4277_v55 }
 0x145   :  { %v2741_v39 = vadd.f32 %v2740_v27, %v2481_v30  ;;  %v3822_v42 = vpop.f32.mrb[40].mxu0  ;;  %v3962_v44 = vpop.f32.mrb[40].mxu1 }
 0x146   :  { %v1581_v45 = vpop.f32.mrb[41].mxu0  ;;  %v2141_v49 = vpop.f32.mrb[41].mxu1  ;;  %v2901_v54 = vadd.f32 %v2900_v33, %v2621_v43  ;;  %v1590_v1 = vadd.f32 %v3822_v42, %v4801_v56  ;;  %v2150_v9 = vadd.f32 %v3962_v44, %v4801_v56 }
 0x147   :  { %v2742_v51 = vadd.f32 %v2741_v39, %v2482_v36  ;;  %v1582_v52 = vadd.f32 %v4801_v56, %v1581_v45  ;;  %v3823_v53 = vpop.f32.mrb[42].mxu0  ;;  %v3963_v57 = vpop.f32.mrb[42].mxu1  ;;  %v2142_v61 = vadd.f32 %v4801_v56, %v2141_v49 }
 0x148   :  { %v1584_v59 = vpop.f32.mrb[43].mxu0  ;;  %v2144_v0 = vpop.f32.mrb[43].mxu1  ;;  %v2902_v8 = vadd.f32 %v2901_v54, %v2622_v47  ;;  %v1593_v15 = vadd.f32 %v3823_v53, %v4801_v56  ;;  %v2153_v20 = vadd.f32 %v3963_v57, %v4801_v56  ;;  %v2486_v21 = vmax.f32 %v1590_v1, 0.0 }
 0x149   :  { %v2484_v4 = vmax.f32 %v1582_v52, 0.0  ;;  %v2743_v6 = vadd.f32 %v2742_v51, %v2483_v50  ;;  %v1585_v7 = vadd.f32 %v4801_v56, %v1584_v59  ;;  %v2624_v11 = vmax.f32 %v2142_v61, 0.0 }
 0x14a   :  { %v2145_v17 = vadd.f32 %v4801_v56, %v2144_v0  ;;  %v2903_v19 = vadd.f32 %v2902_v8, %v2623_v60  ;;  %v2626_v32 = vmax.f32 %v2150_v9, 0.0  ;;  %v2487_v36 = vmax.f32 %v1593_v15, 0.0 }
 0x14b   :  { %v2744_v12 = vadd.f32 %v2743_v6, %v2484_v4  ;;  %v2485_v16 = vmax.f32 %v1585_v7, 0.0  ;;  %v2627_v49 = vmax.f32 %v2153_v20, 0.0 }
 0x14c   :  { %v2625_v25 = vmax.f32 %v2145_v17, 0.0  ;;  %v2904_v33 = vadd.f32 %v2903_v19, %v2624_v11 }
 0x14d   :  { %v2745_v22 = vadd.f32 %v2744_v12, %v2485_v16  ;;  %v3826_v23 = vpop.f32.mrb[44].mxu0  ;;  %v3966_v27 = vpop.f32.mrb[44].mxu1 }
 0x14e   :  { %v1597_v30 = vpop.f32.mrb[45].mxu0  ;;  %v2157_v35 = vpop.f32.mrb[45].mxu1  ;;  %v2905_v50 = vadd.f32 %v2904_v33, %v2625_v25  ;;  %v1606_v52 = vadd.f32 %v3826_v23, %v4801_v56  ;;  %v2166_v60 = vadd.f32 %v3966_v27, %v4801_v56 }
 0x14f   :  { %v2746_v39 = vadd.f32 %v2745_v22, %v2486_v21  ;;  %v1598_v42 = vadd.f32 %v4801_v56, %v1597_v30  ;;  %v3827_v43 = vpop.f32.mrb[46].mxu0  ;;  %v2158_v44 = vadd.f32 %v4801_v56, %v2157_v35  ;;  %v3967_v45 = vpop.f32.mrb[46].mxu1 }
 0x150   :  { %v1600_v47 = vpop.f32.mrb[47].mxu0  ;;  %v2160_v51 = vpop.f32.mrb[47].mxu1  ;;  %v2906_v59 = vadd.f32 %v2905_v50, %v2626_v32  ;;  %v1609_v4 = vadd.f32 %v3827_v43, %v4801_v56  ;;  %v2169_v8 = vadd.f32 %v3967_v45, %v4801_v56  ;;  %v2490_v11 = vmax.f32 %v1606_v52, 0.0 }
 0x151   :  { %v2488_v53 = vmax.f32 %v1598_v42, 0.0  ;;  %v2747_v54 = vadd.f32 %v2746_v39, %v2487_v36  ;;  %v1601_v57 = vadd.f32 %v4801_v56, %v1600_v47  ;;  %v2628_v61 = vmax.f32 %v2158_v44, 0.0 }
 0x152   :  { %v2161_v0 = vadd.f32 %v4801_v56, %v2160_v51  ;;  %v2907_v7 = vadd.f32 %v2906_v59, %v2627_v49  ;;  %v2630_v19 = vmax.f32 %v2166_v60, 0.0  ;;  %v2491_v22 = vmax.f32 %v1609_v4, 0.0 }
 0x153   :  { %v2748_v1 = vadd.f32 %v2747_v54, %v2488_v53  ;;  %v2489_v6 = vmax.f32 %v1601_v57, 0.0  ;;  %v2631_v33 = vmax.f32 %v2169_v8, 0.0 }
 0x154   :  { %v2629_v9 = vmax.f32 %v2161_v0, 0.0  ;;  %v2908_v20 = vadd.f32 %v2907_v7, %v2628_v61 }
 0x155   :  { %v2749_v12 = vadd.f32 %v2748_v1, %v2489_v6  ;;  %v3830_v15 = vpop.f32.mrb[48].mxu0  ;;  %v3970_v16 = vpop.f32.mrb[48].mxu1 }
 0x156   :  { %v1613_v17 = vpop.f32.mrb[49].mxu0  ;;  %v2173_v21 = vpop.f32.mrb[49].mxu1  ;;  %v2909_v35 = vadd.f32 %v2908_v20, %v2629_v9  ;;  %v1622_v39 = vadd.f32 %v3830_v15, %v4801_v56  ;;  %v2182_v47 = vadd.f32 %v3970_v16, %v4801_v56 }
 0x157   :  { %v2750_v23 = vadd.f32 %v2749_v12, %v2490_v11  ;;  %v1614_v25 = vadd.f32 %v4801_v56, %v1613_v17  ;;  %v3831_v27 = vpop.f32.mrb[50].mxu0  ;;  %v2174_v29 = vadd.f32 %v4801_v56, %v2173_v21  ;;  %v3971_v30 = vpop.f32.mrb[50].mxu1 }
 0x158   :  { %v1616_v32 = vpop.f32.mrb[51].mxu0  ;;  %v2176_v36 = vpop.f32.mrb[51].mxu1  ;;  %v2910_v45 = vadd.f32 %v2909_v35, %v2630_v19  ;;  %v1625_v52 = vadd.f32 %v3831_v27, %v4801_v56  ;;  %v2185_v57 = vadd.f32 %v3971_v30, %v4801_v56  ;;  %v2494_v60 = vmax.f32 %v1622_v39, 0.0 }
 0x159   :  { %v2492_v42 = vmax.f32 %v1614_v25, 0.0  ;;  %v2751_v43 = vadd.f32 %v2750_v23, %v2491_v22  ;;  %v1617_v44 = vadd.f32 %v4801_v56, %v1616_v32  ;;  %v2632_v49 = vmax.f32 %v2174_v29, 0.0 }
 0x15a   :  { %v2177_v50 = vadd.f32 %v4801_v56, %v2176_v36  ;;  %v2911_v54 = vadd.f32 %v2910_v45, %v2631_v33  ;;  %v2634_v6 = vmax.f32 %v2182_v47, 0.0  ;;  %v2495_v9 = vmax.f32 %v1625_v52, 0.0 }
 0x15b   :  { %v2752_v51 = vadd.f32 %v2751_v43, %v2492_v42  ;;  %v2493_v53 = vmax.f32 %v1617_v44, 0.0  ;;  %v2635_v20 = vmax.f32 %v2185_v57, 0.0  ;;  %v4235_v44 = vld [vmem:[%s5319_s3 + $0x20] sm:$0xff]  }
 0x15c   :  { %v2633_v59 = vmax.f32 %v2177_v50, 0.0  ;;  %v2912_v7 = vadd.f32 %v2911_v54, %v2632_v49  ;;  %4045 = vmatpush3.bf16.msra.mxu1 %v4235_v44 }
 0x15d   :  { %v2753_v61 = vadd.f32 %v2752_v51, %v2493_v53  ;;  %v3834_v0 = vpop.f32.mrb[52].mxu0  ;;  %v3974_v1 = vpop.f32.mrb[52].mxu1  ;;  %4046 = vmatprep.subr.bf16.mxu1 %v4277_v55 }
 0x15e   :  { %v1629_v4 = vpop.f32.mrb[53].mxu0  ;;  %v2189_v8 = vpop.f32.mrb[53].mxu1  ;;  %v2913_v21 = vadd.f32 %v2912_v7, %v2633_v59  ;;  %v2198_v22 = vadd.f32 %v3974_v1, %v4801_v56  ;;  %v1638_v25 = vadd.f32 %v3834_v0, %v4801_v56 }
 0x15f   :  { %v2754_v11 = vadd.f32 %v2753_v61, %v2494_v60  ;;  %v1630_v12 = vadd.f32 %v4801_v56, %v1629_v4  ;;  %v3835_v15 = vpop.f32.mrb[54].mxu0  ;;  %v2190_v16 = vadd.f32 %v4801_v56, %v2189_v8  ;;  %v3975_v17 = vpop.f32.mrb[54].mxu1  ;;  %v2731_v8 = vrot.slane %v4971_v34, 4 }
 0x160   :  { %v1632_v19 = vpop.f32.mrb[55].mxu0  ;;  %v2192_v23 = vpop.f32.mrb[55].mxu1  ;;  %v2914_v32 = vadd.f32 %v2913_v21, %v2634_v6  ;;  %v2201_v35 = vadd.f32 %v3975_v17, %v4801_v56  ;;  %v1641_v42 = vadd.f32 %v3835_v15, %v4801_v56  ;;  %v2638_v47 = vmax.f32 %v2198_v22, 0.0 }
 0x161   :  { %v2496_v27 = vmax.f32 %v1630_v12, 0.0  ;;  %v2755_v29 = vadd.f32 %v2754_v11, %v2495_v9  ;;  %v1633_v30 = vadd.f32 %v4801_v56, %v1632_v19  ;;  %v2636_v33 = vmax.f32 %v2190_v16, 0.0 }
 0x162   :  { %v2193_v36 = vadd.f32 %v4801_v56, %v2192_v23  ;;  %v5025_v45 = vadd.f32 %v2914_v32, %v2635_v20  ;;  %v2498_v50 = vmax.f32 %v1638_v25, 0.0  ;;  %v2639_v57 = vmax.f32 %v2201_v35, 0.0 }
 0x163   :  { %v2756_v39 = vadd.f32 %v2755_v29, %v2496_v27  ;;  %v2497_v43 = vmax.f32 %v1633_v30, 0.0  ;;  %v2499_v61 = vmax.f32 %v1641_v42, 0.0  ;;  %v2732_v32 = vadd.f32 %v2731_v8, %v4971_v34 }
 0x164   :  { %v2637_v49 = vmax.f32 %v2193_v36, 0.0 }
 0x165   :  { %v2757_v51 = vadd.f32 %v2756_v39, %v2497_v43  ;;  %v3838_v52 = vpop.f32.mrb[56].mxu0  ;;  %v3978_v53 = vpop.f32.mrb[56].mxu1  ;;  %v2733_v34 = vrot.slane %v2732_v32, 2 }
 0x166   :  { %v1645_v54 = vpop.f32.mrb[57].mxu0  ;;  %v2922_v59 = vadd.f32 %v2637_v49, %v2636_v33  ;;  %v2205_v60 = vpop.f32.mrb[57].mxu1  ;;  %v1654_v9 = vadd.f32 %v3838_v52, %v4801_v56  ;;  %v2214_v20 = vadd.f32 %v3978_v53, %v4801_v56 }
 0x167   :  { %v2758_v0 = vadd.f32 %v2757_v51, %v2498_v50  ;;  %v1646_v1 = vadd.f32 %v4801_v56, %v1645_v54  ;;  %v3839_v4 = vpop.f32.mrb[58].mxu0  ;;  %v2206_v6 = vadd.f32 %v4801_v56, %v2205_v60  ;;  %v3979_v7 = vpop.f32.mrb[58].mxu1 }
 0x168   :  { %v1648_v11 = vpop.f32.mrb[59].mxu0  ;;  %v2923_v12 = vadd.f32 %v2922_v59, %v2638_v47  ;;  %v2208_v15 = vpop.f32.mrb[59].mxu1  ;;  %v1657_v21 = vadd.f32 %v3839_v4, %v4801_v56  ;;  %v2217_v29 = vadd.f32 %v3979_v7, %v4801_v56  ;;  %v2502_v35 = vmax.f32 %v1654_v9, 0.0 }
 0x169   :  { %v2500_v16 = vmax.f32 %v1646_v1, 0.0  ;;  %v2759_v17 = vadd.f32 %v2758_v0, %v2499_v61  ;;  %v1649_v19 = vadd.f32 %v4801_v56, %v1648_v11  ;;  %v2640_v22 = vmax.f32 %v2206_v6, 0.0 }
 0x16a   :  { %v2924_v23 = vadd.f32 %v2923_v12, %v2639_v57  ;;  %v2209_v30 = vadd.f32 %v4801_v56, %v2208_v15  ;;  %v2642_v42 = vmax.f32 %v2214_v20, 0.0  ;;  %v2503_v47 = vmax.f32 %v1657_v21, 0.0 }
 0x16b   :  { %v2760_v25 = vadd.f32 %v2759_v17, %v2500_v16  ;;  %v2501_v27 = vmax.f32 %v1649_v19, 0.0  ;;  %v2643_v50 = vmax.f32 %v2217_v29, 0.0  ;;  %v2734_v21 = vadd.f32 %v2733_v34, %v2732_v32 }
 0x16c   :  { %v2925_v33 = vadd.f32 %v2924_v23, %v2640_v22  ;;  %v2641_v43 = vmax.f32 %v2209_v30, 0.0 }
 0x16d   :  { %v2761_v36 = vadd.f32 %v2760_v25, %v2501_v27  ;;  %v3842_v39 = vpop.f32.mrb[60].mxu0  ;;  %v3982_v44 = vpop.f32.mrb[60].mxu1  ;;  %v2735_v32 = vrot.slane %v2734_v21, 1 }
 0x16e   :  { %v1661_v49 = vpop.f32.mrb[61].mxu0  ;;  %v2221_v51 = vpop.f32.mrb[61].mxu1  ;;  %v2926_v57 = vadd.f32 %v2925_v33, %v2641_v43  ;;  %v1670_v61 = vadd.f32 %v3842_v39, %v4801_v56  ;;  %v2230_v1 = vadd.f32 %v3982_v44, %v4801_v56 }
 0x16f   :  { %v2762_v52 = vadd.f32 %v2761_v36, %v2502_v35  ;;  %v1662_v53 = vadd.f32 %v4801_v56, %v1661_v49  ;;  %v3843_v54 = vpop.f32.mrb[62].mxu0  ;;  %v2222_v59 = vadd.f32 %v4801_v56, %v2221_v51  ;;  %v3983_v60 = vpop.f32.mrb[62].mxu1 }
 0x170   :  { %v1664_v0 = vpop.f32.mrb[63].mxu0  ;;  %v2224_v4 = vpop.f32.mrb[63].mxu1  ;;  %v2927_v9 = vadd.f32 %v2926_v57, %v2642_v42  ;;  %v1673_v11 = vadd.f32 %v3843_v54, %v4801_v56  ;;  %v2233_v15 = vadd.f32 %v3983_v60, %v4801_v56  ;;  %v2506_v22 = vmax.f32 %v1670_v61, 0.0 }
 0x171   :  { %v2504_v6 = vmax.f32 %v1662_v53, 0.0  ;;  %v2763_v7 = vadd.f32 %v2762_v52, %v2503_v47  ;;  %v1665_v8 = vadd.f32 %v4801_v56, %v1664_v0  ;;  %v2644_v12 = vmax.f32 %v2222_v59, 0.0  ;;  %v5052_v59 = vld [vmem:[%s5318_s2] ss:$0 sm:$0xff] }
 0x172   :  { %v2928_v19 = vadd.f32 %v2927_v9, %v2643_v50  ;;  %v2225_v20 = vadd.f32 %v4801_v56, %v2224_v4  ;;  %v2646_v27 = vmax.f32 %v2230_v1, 0.0  ;;  %v2507_v35 = vmax.f32 %v1673_v11, 0.0 }
 0x173   :  { %v2764_v16 = vadd.f32 %v2763_v7, %v2504_v6  ;;  %v2505_v17 = vmax.f32 %v1665_v8, 0.0  ;;  %v2647_v39 = vmax.f32 %v2233_v15, 0.0 }
 0x174   :  { %v2929_v29 = vadd.f32 %v2928_v19, %v2644_v12  ;;  %v2645_v30 = vmax.f32 %v2225_v20, 0.0 }
 0x175   :  { %v2765_v23 = vadd.f32 %v2764_v16, %v2505_v17  ;;  %v3846_v25 = vpop.f32.mrb[64].mxu0  ;;  %v3986_v33 = vpop.f32.mrb[64].mxu1 }
 0x176   :  { %v1677_v36 = vpop.f32.mrb[65].mxu0  ;;  %v2237_v42 = vpop.f32.mrb[65].mxu1  ;;  %v2930_v49 = vadd.f32 %v2929_v29, %v2645_v30  ;;  %v1686_v57 = vadd.f32 %v3846_v25, %v4801_v56  ;;  %v2246_v0 = vadd.f32 %v5052_v59, %v3986_v33 }
 0x177   :  { %v2766_v43 = vadd.f32 %v2765_v23, %v2506_v22  ;;  %v1678_v44 = vadd.f32 %v4801_v56, %v1677_v36  ;;  %v3847_v47 = vpop.f32.mrb[66].mxu0  ;;  %v2238_v50 = vadd.f32 %v4801_v56, %v2237_v42  ;;  %v3987_v51 = vpop.f32.mrb[66].mxu1  ;;  %v2736_v56 = vadd.f32 %v2735_v32, %v2734_v21 }
 0x178   :  { %v1680_v52 = vpop.f32.mrb[67].mxu0  ;;  %v2240_v53 = vpop.f32.mrb[67].mxu1  ;;  %v2931_v34 = vadd.f32 %v2930_v49, %v2646_v27  ;;  %v1689_v61 = vadd.f32 %v5052_v59, %v3847_v47  ;;  %v2249_v11 = vadd.f32 %v5052_v59, %v3987_v51  ;;  %v2510_v16 = vmax.f32 %v1686_v57, 0.0 }
 0x179   :  { %v2767_v54 = vadd.f32 %v2766_v43, %v2507_v35  ;;  %v1681_v60 = vadd.f32 %v5052_v59, %v1680_v52  ;;  %v2648_v1 = vmax.f32 %v2238_v50, 0.0  ;;  %v2241_v4 = vadd.f32 %v5052_v59, %v2240_v53 }
 0x17a   :  { %v2508_v7 = vmax.f32 %v1678_v44, 0.0  ;;  %v2932_v9 = vadd.f32 %v2931_v34, %v2647_v39  ;;  %v2511_v23 = vmax.f32 %v1689_v61, 0.0  ;;  %v2650_v27 = vmax.f32 %v2246_v0, 0.0 }
 0x17b   :  { %v2768_v6 = vrot.slane %v2767_v54, 4  ;;  %v2509_v8 = vmax.f32 %v1681_v60, 0.0  ;;  %v2649_v12 = vmax.f32 %v2241_v4, 0.0  ;;  %v2996_v42 = vmul.f32 0.00390625, %v2736_v56 }
 0x17c   :  { %v2933_v20 = vadd.f32 %v2932_v9, %v2648_v1  ;;  %v2651_v47 = vmax.f32 %v2249_v11, 0.0 }
 0x17d   :  { %v2769_v15 = vadd.f32 %v2768_v6, %v2767_v54  ;;  %v2774_v17 = vadd.f32 %v2509_v8, %v2508_v7  ;;  %v3850_v19 = vpop.f32.mrb[68].mxu0  ;;  %v3990_v22 = vpop.f32.mrb[68].mxu1  ;;  %v3004_v6 = vpack.c.bf16 %v2996_v42, %v2996_v42 }
 0x17e   :  { %v1693_v25 = vpop.f32.mrb[69].mxu0  ;;  %v2253_v29 = vpop.f32.mrb[69].mxu1  ;;  %v2934_v39 = vadd.f32 %v2933_v20, %v2649_v12  ;;  %v1702_v43 = vadd.f32 %v5052_v59, %v3850_v19  ;;  %v2262_v60 = vadd.f32 %v5052_v59, %v3990_v22 }
 0x17f   :  { %v2770_v30 = vrot.slane %v2769_v15, 2  ;;  %v2775_v33 = vadd.f32 %v2774_v17, %v2510_v16  ;;  %v1694_v35 = vadd.f32 %v5052_v59, %v1693_v25  ;;  %v3851_v36 = vpop.f32.mrb[70].mxu0  ;;  %v3991_v21 = vpop.f32.mrb[70].mxu1  ;;  %v2254_v49 = vadd.f32 %v5052_v59, %v2253_v29 }
 0x180   :  { %v1696_v44 = vpop.f32.mrb[71].mxu0  ;;  %v2256_v50 = vpop.f32.mrb[71].mxu1  ;;  %v1705_v54 = vadd.f32 %v5052_v59, %v3851_v36  ;;  %v2935_v57 = vadd.f32 %v2934_v39, %v2650_v27  ;;  %v2265_v8 = vadd.f32 %v5052_v59, %v3991_v21  ;;  %v2514_v56 = vmax.f32 %v1702_v43, 0.0 }
 0x181   :  { %v2771_v51 = vadd.f32 %v2770_v30, %v2769_v15  ;;  %v2512_v32 = vmax.f32 %v1694_v35, 0.0  ;;  %v2776_v52 = vadd.f32 %v2775_v33, %v2511_v23  ;;  %v1697_v53 = vadd.f32 %v5052_v59, %v1696_v44 }
 0x182   :  { %v2652_v34 = vmax.f32 %v2254_v49, 0.0  ;;  %v2257_v4 = vadd.f32 %v5052_v59, %v2256_v50  ;;  %v2936_v7 = vadd.f32 %v2935_v57, %v2651_v47  ;;  %v2515_v17 = vmax.f32 %v1705_v54, 0.0 }
 0x183   :  { %v2772_v61 = vrot.slane %v2771_v51, 1  ;;  %v2777_v0 = vadd.f32 %v2776_v52, %v2512_v32  ;;  %v2513_v1 = vmax.f32 %v1697_v53, 0.0  ;;  %v2654_v20 = vmax.f32 %v2262_v60, 0.0 }
 0x184   :  { %v2653_v15 = vmax.f32 %v2257_v4, 0.0  ;;  %v2937_v22 = vadd.f32 %v2936_v7, %v2652_v34  ;;  %v3043_v36 = vunpack.c.l.b16 %v3004_v6  ;;  %v2655_v42 = vmax.f32 %v2265_v8, 0.0 }
 0x185   :  { %v2773_v9 = vadd.f32 %v2772_v61, %v2771_v51  ;;  %v2778_v11 = vadd.f32 %v2777_v0, %v2513_v1  ;;  %v3854_v12 = vpop.f32.mrb[72].mxu0  ;;  %v3994_v16 = vpop.f32.mrb[72].mxu1 }
 0x186   :  { %v1709_v19 = vpop.f32.mrb[73].mxu0  ;;  %v2269_v23 = vpop.f32.mrb[73].mxu1  ;;  %v1718_v39 = vadd.f32 %v5052_v59, %v3854_v12  ;;  %v2938_v43 = vadd.f32 %v2937_v22, %v2653_v15  ;;  %v2278_v53 = vadd.f32 %v5052_v59, %v3994_v16 }
 0x187   :  { %v2997_v25 = vmul.f32 0.00390625, %v2773_v9  ;;  %v2779_v27 = vadd.f32 %v2778_v11, %v2514_v56  ;;  %v1710_v29 = vadd.f32 %v5052_v59, %v1709_v19  ;;  %v3855_v30 = vpop.f32.mrb[74].mxu0  ;;  %v2270_v33 = vadd.f32 %v5052_v59, %v2269_v23  ;;  %v3995_v35 = vpop.f32.mrb[74].mxu1  ;;  %v4236_v11 = vld [vmem:[%s5319_s3 + $0x28] sm:$0xff]  }
 0x188   :  { %v1712_v21 = vpop.f32.mrb[75].mxu0  ;;  %v2272_v44 = vpop.f32.mrb[75].mxu1  ;;  %v1721_v32 = vadd.f32 %v5052_v59, %v3855_v30  ;;  %v2939_v52 = vadd.f32 %v2938_v43, %v2654_v20  ;;  %v2281_v1 = vadd.f32 %v5052_v59, %v3995_v35  ;;  %v2518_v6 = vmax.f32 %v1718_v39, 0.0  ;;  %4047 = vmatpush3.bf16.msra.mxu1 %v4236_v11 }
 0x189   :  { %v3005_v47 = vpack.c.bf16 %v2997_v25, %v2997_v25  ;;  %v2516_v49 = vmax.f32 %v1710_v29, 0.0  ;;  %v2780_v50 = vadd.f32 %v2779_v27, %v2515_v17  ;;  %v1713_v51 = vadd.f32 %v5052_v59, %v1712_v21  ;;  %4048 = vmatprep.subr.bf16.mxu1 %v4277_v55 }
 0x18a   :  { %v2656_v54 = vmax.f32 %v2270_v33, 0.0  ;;  %v2273_v61 = vadd.f32 %v5052_v59, %v2272_v44  ;;  %v2940_v0 = vadd.f32 %v2939_v52, %v2655_v42  ;;  %v2658_v15 = vmax.f32 %v2278_v53, 0.0 }
 0x18b   :  { %v3044_v57 = vunpack.c.l.b16 %v3005_v47  ;;  %v2781_v60 = vadd.f32 %v2780_v50, %v2516_v49  ;;  %v2517_v34 = vmax.f32 %v1713_v51, 0.0  ;;  %v2519_v19 = vmax.f32 %v1721_v32, 0.0 }
 0x18c   :  { %v2657_v9 = vmax.f32 %v2273_v61, 0.0  ;;  %v2941_v16 = vadd.f32 %v2940_v0, %v2656_v54  ;;  %v2659_v30 = vmax.f32 %v2281_v1, 0.0 }
 0x18d   :  { %v5076_v4 = vsel %vm3051_vm1, %v3044_v57, %v3043_v36  ;;  %v2782_v7 = vadd.f32 %v2781_v60, %v2517_v34  ;;  %v3858_v8 = vpop.f32.mrb[76].mxu0  ;;  %v3998_v56 = vpop.f32.mrb[76].mxu1 }
 0x18e   :  { %v1725_v12 = vpop.f32.mrb[77].mxu0  ;;  %v2285_v17 = vpop.f32.mrb[77].mxu1  ;;  %v2942_v33 = vadd.f32 %v2941_v16, %v2657_v9  ;;  %v1734_v36 = vadd.f32 %v5052_v59, %v3858_v8  ;;  %v2294_v44 = vadd.f32 %v5052_v59, %v3998_v56 }
 0x18f   :  { %v2783_v20 = vadd.f32 %v2782_v7, %v2518_v6  ;;  %v1726_v22 = vadd.f32 %v5052_v59, %v1725_v12  ;;  %v3859_v23 = vpop.f32.mrb[78].mxu0  ;;  %v2286_v25 = vadd.f32 %v5052_v59, %v2285_v17  ;;  %v3999_v27 = vpop.f32.mrb[78].mxu1 }
 0x190   :  { %v1728_v29 = vpop.f32.mrb[79].mxu0  ;;  %v2288_v35 = vpop.f32.mrb[79].mxu1  ;;  %v2943_v43 = vadd.f32 %v2942_v33, %v2658_v15  ;;  %v1737_v51 = vadd.f32 %v5052_v59, %v3859_v23  ;;  %v2297_v53 = vadd.f32 %v5052_v59, %v3999_v27  ;;  %v2522_v57 = vmax.f32 %v1734_v36, 0.0 }
 0x191   :  { %v2520_v39 = vmax.f32 %v1726_v22, 0.0  ;;  %v2784_v21 = vadd.f32 %v2783_v20, %v2519_v19  ;;  %v1729_v42 = vadd.f32 %v5052_v59, %v1728_v29  ;;  %v2660_v47 = vmax.f32 %v2286_v25, 0.0 }
 0x192   :  { %v2289_v49 = vadd.f32 %v5052_v59, %v2288_v35  ;;  %v2944_v52 = vadd.f32 %v2943_v43, %v2659_v30  ;;  %v2662_v1 = vmax.f32 %v2294_v44, 0.0  ;;  %v2523_v8 = vmax.f32 %v1737_v51, 0.0 }
 0x193   :  { %v2785_v50 = vadd.f32 %v2784_v21, %v2520_v39  ;;  %v2521_v32 = vmax.f32 %v1729_v42, 0.0  ;;  %v2663_v17 = vmax.f32 %v2297_v53, 0.0 }
 0x194   :  { %v2661_v54 = vmax.f32 %v2289_v49, 0.0  ;;  %v2945_v6 = vadd.f32 %v2944_v52, %v2660_v47 }
 0x195   :  { %v2786_v60 = vadd.f32 %v2785_v50, %v2521_v32  ;;  %v3862_v34 = vpop.f32.mrb[80].mxu0  ;;  %v4002_v61 = vpop.f32.mrb[80].mxu1 }
 0x196   :  { %v1741_v0 = vpop.f32.mrb[81].mxu0  ;;  %v2301_v7 = vpop.f32.mrb[81].mxu1  ;;  %v2946_v19 = vadd.f32 %v2945_v6, %v2661_v54  ;;  %v1750_v22 = vadd.f32 %v5052_v59, %v3862_v34  ;;  %v2310_v30 = vadd.f32 %v5052_v59, %v4002_v61 }
 0x197   :  { %v2787_v9 = vadd.f32 %v2786_v60, %v2522_v57  ;;  %v1742_v56 = vadd.f32 %v5052_v59, %v1741_v0  ;;  %v3863_v11 = vpop.f32.mrb[82].mxu0  ;;  %v2302_v12 = vadd.f32 %v5052_v59, %v2301_v7  ;;  %v4003_v15 = vpop.f32.mrb[82].mxu1 }
 0x198   :  { %v1744_v16 = vpop.f32.mrb[83].mxu0  ;;  %v2304_v20 = vpop.f32.mrb[83].mxu1  ;;  %v2947_v29 = vadd.f32 %v2946_v19, %v2662_v1  ;;  %v1753_v39 = vadd.f32 %v5052_v59, %v3863_v11  ;;  %v2313_v43 = vadd.f32 %v5052_v59, %v4003_v15  ;;  %v2526_v47 = vmax.f32 %v1750_v22, 0.0 }
 0x199   :  { %v2524_v23 = vmax.f32 %v1742_v56, 0.0  ;;  %v2788_v25 = vadd.f32 %v2787_v9, %v2523_v8  ;;  %v1745_v27 = vadd.f32 %v5052_v59, %v1744_v16  ;;  %v2664_v33 = vmax.f32 %v2302_v12, 0.0 }
 0x19a   :  { %v2305_v35 = vadd.f32 %v5052_v59, %v2304_v20  ;;  %v2948_v42 = vadd.f32 %v2947_v29, %v2663_v17  ;;  %v2666_v52 = vmax.f32 %v2310_v30, 0.0  ;;  %v2527_v57 = vmax.f32 %v1753_v39, 0.0 }
 0x19b   :  { %v2789_v36 = vadd.f32 %v2788_v25, %v2524_v23  ;;  %v2525_v21 = vmax.f32 %v1745_v27, 0.0  ;;  %v2667_v7 = vmax.f32 %v2313_v43, 0.0 }
 0x19c   :  { %v2665_v44 = vmax.f32 %v2305_v35, 0.0  ;;  %v2949_v53 = vadd.f32 %v2948_v42, %v2664_v33 }
 0x19d   :  { %v2790_v49 = vadd.f32 %v2789_v36, %v2525_v21  ;;  %v3866_v50 = vpop.f32.mrb[84].mxu0  ;;  %v4006_v51 = vpop.f32.mrb[84].mxu1 }
 0x19e   :  { %v1757_v32 = vpop.f32.mrb[85].mxu0  ;;  %v2317_v54 = vpop.f32.mrb[85].mxu1  ;;  %v2950_v8 = vadd.f32 %v2949_v53, %v2665_v44  ;;  %v2326_v9 = vadd.f32 %v5052_v59, %v4006_v51  ;;  %v1766_v11 = vadd.f32 %v5052_v59, %v3866_v50 }
 0x19f   :  { %v2791_v60 = vadd.f32 %v2790_v49, %v2526_v47  ;;  %v1758_v34 = vadd.f32 %v5052_v59, %v1757_v32  ;;  %v3867_v61 = vpop.f32.mrb[86].mxu0  ;;  %v2318_v0 = vadd.f32 %v5052_v59, %v2317_v54  ;;  %v4007_v1 = vpop.f32.mrb[86].mxu1 }
 0x1a0   :  { %v1760_v6 = vpop.f32.mrb[87].mxu0  ;;  %v2320_v56 = vpop.f32.mrb[87].mxu1  ;;  %v2951_v17 = vadd.f32 %v2950_v8, %v2666_v52  ;;  %v2329_v20 = vadd.f32 %v5052_v59, %v4007_v1  ;;  %v1769_v25 = vadd.f32 %v5052_v59, %v3867_v61  ;;  %v2670_v30 = vmax.f32 %v2326_v9, 0.0 }
 0x1a1   :  { %v2528_v12 = vmax.f32 %v1758_v34, 0.0  ;;  %v2792_v15 = vadd.f32 %v2791_v60, %v2527_v57  ;;  %v1761_v16 = vadd.f32 %v5052_v59, %v1760_v6  ;;  %v2668_v19 = vmax.f32 %v2318_v0, 0.0 }
 0x1a2   :  { %v2321_v22 = vadd.f32 %v5052_v59, %v2320_v56  ;;  %v5106_v29 = vadd.f32 %v2951_v17, %v2667_v7  ;;  %v2530_v35 = vmax.f32 %v1766_v11, 0.0  ;;  %v2671_v43 = vmax.f32 %v2329_v20, 0.0 }
 0x1a3   :  { %v2793_v23 = vadd.f32 %v2792_v15, %v2528_v12  ;;  %v2529_v27 = vmax.f32 %v1761_v16, 0.0  ;;  %v2531_v49 = vmax.f32 %v1769_v25, 0.0 }
 0x1a4   :  { %v2669_v33 = vmax.f32 %v2321_v22, 0.0 }
 0x1a5   :  { %v2794_v36 = vadd.f32 %v2793_v23, %v2529_v27  ;;  %v3870_v39 = vpop.f32.mrb[88].mxu0  ;;  %v4010_v21 = vpop.f32.mrb[88].mxu1 }
 0x1a6   :  { %v1773_v42 = vpop.f32.mrb[89].mxu0  ;;  %v2959_v44 = vadd.f32 %v2669_v33, %v2668_v19  ;;  %v2333_v47 = vpop.f32.mrb[89].mxu1  ;;  %v1782_v54 = vadd.f32 %v5052_v59, %v3870_v39  ;;  %v2342_v6 = vadd.f32 %v5052_v59, %v4010_v21 }
 0x1a7   :  { %v2795_v50 = vadd.f32 %v2794_v36, %v2530_v35  ;;  %v1774_v51 = vadd.f32 %v5052_v59, %v1773_v42  ;;  %v3871_v32 = vpop.f32.mrb[90].mxu0  ;;  %v2334_v52 = vadd.f32 %v5052_v59, %v2333_v47  ;;  %v4011_v53 = vpop.f32.mrb[90].mxu1  ;;  %v4237_v47 = vld [vmem:[%s5319_s3 + $0x30] sm:$0xff]  }
 0x1a8   :  { %v1776_v57 = vpop.f32.mrb[91].mxu0  ;;  %v2960_v60 = vadd.f32 %v2959_v44, %v2670_v30  ;;  %v2336_v34 = vpop.f32.mrb[91].mxu1  ;;  %v1785_v7 = vadd.f32 %v5052_v59, %v3871_v32  ;;  %v2345_v12 = vadd.f32 %v5052_v59, %v4011_v53  ;;  %v2534_v17 = vmax.f32 %v1782_v54, 0.0  ;;  %4049 = vmatpush3.bf16.msra.mxu1 %v4237_v47 }
 0x1a9   :  { %v2532_v61 = vmax.f32 %v1774_v51, 0.0  ;;  %v2796_v0 = vadd.f32 %v2795_v50, %v2531_v49  ;;  %v1777_v1 = vadd.f32 %v5052_v59, %v1776_v57  ;;  %v2672_v8 = vmax.f32 %v2334_v52, 0.0  ;;  %4050 = vmatprep.subr.bf16.mxu1 %v4277_v55 }
 0x1aa   :  { %v2961_v9 = vadd.f32 %v2960_v60, %v2671_v43  ;;  %v2337_v15 = vadd.f32 %v5052_v59, %v2336_v34  ;;  %v2674_v22 = vmax.f32 %v2342_v6, 0.0  ;;  %v2535_v27 = vmax.f32 %v1785_v7, 0.0  ;;  %v4238_v60 = vld [vmem:[%s5319_s3 + $0x38] sm:$0xff]  }
 0x1ab   :  { %v2797_v56 = vadd.f32 %v2796_v0, %v2532_v61  ;;  %v2533_v11 = vmax.f32 %v1777_v1, 0.0  ;;  %v2675_v33 = vmax.f32 %v2345_v12, 0.0 }
 0x1ac   :  { %v2962_v16 = vadd.f32 %v2961_v9, %v2672_v8  ;;  %v2673_v23 = vmax.f32 %v2337_v15, 0.0  ;;  %4051 = vmatpush3.bf16.msra.mxu1 %v4238_v60 }
 0x1ad   :  { %v2798_v19 = vadd.f32 %v2797_v56, %v2533_v11  ;;  %v3874_v20 = vpop.f32.mrb[92].mxu0  ;;  %v4014_v25 = vpop.f32.mrb[92].mxu1  ;;  %4056 = vmatprep.subr.bf16.mxu1 %v4277_v55 }
 0x1ae   :  { %v1789_v30 = vpop.f32.mrb[93].mxu0  ;;  %v2349_v35 = vpop.f32.mrb[93].mxu1  ;;  %v2963_v42 = vadd.f32 %v2962_v16, %v2673_v23  ;;  %v1798_v49 = vadd.f32 %v5052_v59, %v3874_v20  ;;  %v2358_v51 = vadd.f32 %v5052_v59, %v4014_v25 }
 0x1af   :  { %v2799_v36 = vadd.f32 %v2798_v19, %v2534_v17  ;;  %v1790_v39 = vadd.f32 %v5052_v59, %v1789_v30  ;;  %v3875_v21 = vpop.f32.mrb[94].mxu0  ;;  %v2350_v43 = vadd.f32 %v5052_v59, %v2349_v35  ;;  %v4015_v44 = vpop.f32.mrb[94].mxu1 }
 0x1b0   :  { %v1792_v50 = vpop.f32.mrb[95].mxu0  ;;  %v2352_v32 = vpop.f32.mrb[95].mxu1  ;;  %v2964_v57 = vadd.f32 %v2963_v42, %v2674_v22  ;;  %v1801_v34 = vadd.f32 %v5052_v59, %v3875_v21  ;;  %v2361_v0 = vadd.f32 %v5052_v59, %v4015_v44  ;;  %v2538_v9 = vmax.f32 %v1798_v49, 0.0 }
 0x1b1   :  { %v2536_v52 = vmax.f32 %v1790_v39, 0.0  ;;  %v2800_v53 = vadd.f32 %v2799_v36, %v2535_v27  ;;  %v1793_v54 = vadd.f32 %v5052_v59, %v1792_v50  ;;  %v2676_v61 = vmax.f32 %v2350_v43, 0.0 }
 0x1b2   :  { %v2965_v7 = vadd.f32 %v2964_v57, %v2675_v33  ;;  %v2353_v8 = vadd.f32 %v5052_v59, %v2352_v32  ;;  %v2678_v12 = vmax.f32 %v2358_v51, 0.0  ;;  %v2539_v19 = vmax.f32 %v1801_v34, 0.0 }
 0x1b3   :  { %v2801_v1 = vadd.f32 %v2800_v53, %v2536_v52  ;;  %v2537_v6 = vmax.f32 %v1793_v54, 0.0  ;;  %v2679_v22 = vmax.f32 %v2361_v0, 0.0 }
 0x1b4   :  { %v2966_v15 = vadd.f32 %v2965_v7, %v2676_v61  ;;  %v2677_v16 = vmax.f32 %v2353_v8, 0.0 }
 0x1b5   :  { %v2802_v56 = vadd.f32 %v2801_v1, %v2537_v6  ;;  %v3878_v11 = vpop.f32.mrb[96].mxu0  ;;  %v4018_v17 = vpop.f32.mrb[96].mxu1 }
 0x1b6   :  { %v1805_v20 = vpop.f32.mrb[97].mxu0  ;;  %v2365_v23 = vpop.f32.mrb[97].mxu1  ;;  %v2967_v33 = vadd.f32 %v2966_v15, %v2677_v16  ;;  %v1814_v43 = vadd.f32 %v5052_v59, %v3878_v11  ;;  %v2374_v50 = vadd.f32 %v5052_v59, %v4018_v17 }
 0x1b7   :  { %v2803_v25 = vadd.f32 %v2802_v56, %v2538_v9  ;;  %v1806_v27 = vadd.f32 %v5052_v59, %v1805_v20  ;;  %v3879_v30 = vpop.f32.mrb[98].mxu0  ;;  %v2366_v35 = vadd.f32 %v5052_v59, %v2365_v23  ;;  %v4019_v36 = vpop.f32.mrb[98].mxu1 }
 0x1b8   :  { %v1808_v39 = vpop.f32.mrb[99].mxu0  ;;  %v2368_v21 = vpop.f32.mrb[99].mxu1  ;;  %v2968_v47 = vadd.f32 %v2967_v33, %v2678_v12  ;;  %v1817_v49 = vadd.f32 %v5052_v59, %v3879_v30  ;;  %v2377_v60 = vadd.f32 %v5052_v59, %v4019_v36  ;;  %v2542_v0 = vmax.f32 %v1814_v43, 0.0 }
 0x1b9   :  { %v2804_v42 = vadd.f32 %v2803_v25, %v2539_v19  ;;  %v1809_v44 = vadd.f32 %v5052_v59, %v1808_v39  ;;  %v2680_v51 = vmax.f32 %v2366_v35, 0.0  ;;  %v2369_v32 = vadd.f32 %v5052_v59, %v2368_v21 }
 0x1ba   :  { %v2540_v53 = vmax.f32 %v1806_v27, 0.0  ;;  %v2969_v57 = vadd.f32 %v2968_v47, %v2679_v22  ;;  %v2543_v9 = vmax.f32 %v1817_v49, 0.0  ;;  %v2682_v11 = vmax.f32 %v2374_v50, 0.0 }
 0x1bb   :  { %v2805_v52 = vrot.slane %v2804_v42, 4  ;;  %v2541_v54 = vmax.f32 %v1809_v44, 0.0  ;;  %v2681_v34 = vmax.f32 %v2369_v32, 0.0  ;;  %v2683_v27 = vmax.f32 %v2377_v60, 0.0 }
 0x1bc   :  { %v2970_v7 = vadd.f32 %v2969_v57, %v2680_v51 }
 0x1bd   :  { %v2806_v61 = vadd.f32 %v2805_v52, %v2804_v42  ;;  %v2811_v1 = vadd.f32 %v2541_v54, %v2540_v53  ;;  %v3882_v6 = vpop.f32.mrb[100].mxu0  ;;  %v4022_v8 = vpop.f32.mrb[100].mxu1 }
 0x1be   :  { %v1821_v56 = vpop.f32.mrb[101].mxu0  ;;  %v2381_v12 = vpop.f32.mrb[101].mxu1  ;;  %v2971_v20 = vadd.f32 %v2970_v7, %v2681_v34  ;;  %v1830_v23 = vadd.f32 %v5052_v59, %v3882_v6  ;;  %v2390_v44 = vadd.f32 %v5052_v59, %v4022_v8 }
 0x1bf   :  { %v2807_v15 = vrot.slane %v2806_v61, 2  ;;  %v2812_v16 = vadd.f32 %v2811_v1, %v2542_v0  ;;  %v1822_v17 = vadd.f32 %v5052_v59, %v1821_v56  ;;  %v3883_v19 = vpop.f32.mrb[102].mxu0  ;;  %v4023_v22 = vpop.f32.mrb[102].mxu1  ;;  %v2382_v30 = vadd.f32 %v5052_v59, %v2381_v12 }
 0x1c0   :  { %v1824_v25 = vpop.f32.mrb[103].mxu0  ;;  %v2384_v33 = vpop.f32.mrb[103].mxu1  ;;  %v1833_v42 = vadd.f32 %v5052_v59, %v3883_v19  ;;  %v2972_v43 = vadd.f32 %v2971_v20, %v2682_v11  ;;  %v2393_v53 = vadd.f32 %v5052_v59, %v4023_v22  ;;  %v2546_v57 = vmax.f32 %v1830_v23, 0.0 }
 0x1c1   :  { %v2808_v35 = vadd.f32 %v2807_v15, %v2806_v61  ;;  %v2544_v36 = vmax.f32 %v1822_v17, 0.0  ;;  %v2813_v39 = vadd.f32 %v2812_v16, %v2543_v9  ;;  %v1825_v21 = vadd.f32 %v5052_v59, %v1824_v25 }
 0x1c2   :  { %v2684_v47 = vmax.f32 %v2382_v30, 0.0  ;;  %v2385_v32 = vadd.f32 %v5052_v59, %v2384_v33  ;;  %v2973_v52 = vadd.f32 %v2972_v43, %v2683_v27  ;;  %v2547_v1 = vmax.f32 %v1833_v42, 0.0 }
 0x1c3   :  { %v2809_v49 = vrot.slane %v2808_v35, 1  ;;  %v2814_v50 = vadd.f32 %v2813_v39, %v2544_v36  ;;  %v2545_v51 = vmax.f32 %v1825_v21, 0.0  ;;  %v2686_v7 = vmax.f32 %v2390_v44, 0.0 }
 0x1c4   :  { %v2685_v61 = vmax.f32 %v2385_v32, 0.0  ;;  %v2974_v9 = vadd.f32 %v2973_v52, %v2684_v47  ;;  %v2687_v22 = vmax.f32 %v2393_v53, 0.0 }
 0x1c5   :  { %v2810_v54 = vadd.f32 %v2809_v49, %v2808_v35  ;;  %v2815_v60 = vadd.f32 %v2814_v50, %v2545_v51  ;;  %v3886_v34 = vpop.f32.mrb[104].mxu0  ;;  %v4026_v0 = vpop.f32.mrb[104].mxu1 }
 0x1c6   :  { %v1837_v6 = vpop.f32.mrb[105].mxu0  ;;  %v2397_v8 = vpop.f32.mrb[105].mxu1  ;;  %v1846_v19 = vadd.f32 %v5052_v59, %v3886_v34  ;;  %v2975_v23 = vadd.f32 %v2974_v9, %v2685_v61  ;;  %v2406_v21 = vadd.f32 %v5052_v59, %v4026_v0 }
 0x1c7   :  { %v2998_v56 = vmul.f32 0.00390625, %v2810_v54  ;;  %v2816_v11 = vadd.f32 %v2815_v60, %v2546_v57  ;;  %v1838_v12 = vadd.f32 %v5052_v59, %v1837_v6  ;;  %v3887_v15 = vpop.f32.mrb[106].mxu0  ;;  %v2398_v16 = vadd.f32 %v5052_v59, %v2397_v8  ;;  %v4027_v17 = vpop.f32.mrb[106].mxu1 }
 0x1c8   :  { %v1840_v20 = vpop.f32.mrb[107].mxu0  ;;  %v2400_v25 = vpop.f32.mrb[107].mxu1  ;;  %v1849_v36 = vadd.f32 %v5052_v59, %v3887_v15  ;;  %v2976_v39 = vadd.f32 %v2975_v23, %v2686_v7  ;;  %v2409_v51 = vadd.f32 %v5052_v59, %v4027_v17  ;;  %v2550_v52 = vmax.f32 %v1846_v19, 0.0 }
 0x1c9   :  { %v3006_v27 = vpack.c.bf16 %v2998_v56, %v2998_v56  ;;  %v2548_v30 = vmax.f32 %v1838_v12, 0.0  ;;  %v2817_v33 = vadd.f32 %v2816_v11, %v2547_v1  ;;  %v1841_v35 = vadd.f32 %v5052_v59, %v1840_v20 }
 0x1ca   :  { %v2688_v42 = vmax.f32 %v2398_v16, 0.0  ;;  %v2401_v49 = vadd.f32 %v5052_v59, %v2400_v25  ;;  %v2977_v50 = vadd.f32 %v2976_v39, %v2687_v22  ;;  %v2690_v61 = vmax.f32 %v2406_v21, 0.0 }
 0x1cb   :  { %v3045_v43 = vunpack.c.l.b16 %v3006_v27  ;;  %v2818_v44 = vadd.f32 %v2817_v33, %v2548_v30  ;;  %v2549_v47 = vmax.f32 %v1841_v35, 0.0  ;;  %v2551_v6 = vmax.f32 %v1849_v36, 0.0 }
 0x1cc   :  { %v2689_v57 = vmax.f32 %v2401_v49, 0.0  ;;  %v2978_v0 = vadd.f32 %v2977_v50, %v2688_v42 }
 0x1cd   :  { %v5160_v32 = vsel %vm3053_vm3, %v3045_v43, %v5076_v4  ;;  %v2819_v53 = vadd.f32 %v2818_v44, %v2549_v47  ;;  %v3890_v54 = vpop.f32.mrb[108].mxu0  ;;  %v4030_v60 = vpop.f32.mrb[108].mxu1  ;;  %v2691_v4 = vmax.f32 %v2409_v51, 0.0 }
 0x1ce   :  { %v1853_v34 = vpop.f32.mrb[109].mxu0  ;;  %v2413_v1 = vpop.f32.mrb[109].mxu1  ;;  %v2979_v15 = vadd.f32 %v2978_v0, %v2689_v57  ;;  %v1862_v17 = vadd.f32 %v5052_v59, %v3890_v54  ;;  %v2422_v25 = vadd.f32 %v5052_v59, %v4030_v60 }
 0x1cf   :  { %v2820_v7 = vadd.f32 %v2819_v53, %v2550_v52  ;;  %v1854_v9 = vadd.f32 %v5052_v59, %v1853_v34  ;;  %v3891_v8 = vpop.f32.mrb[110].mxu0  ;;  %v2414_v56 = vadd.f32 %v5052_v59, %v2413_v1  ;;  %v4031_v11 = vpop.f32.mrb[110].mxu1 }
 0x1d0   :  { %v1856_v12 = vpop.f32.mrb[111].mxu0  ;;  %v2416_v16 = vpop.f32.mrb[111].mxu1  ;;  %v2980_v23 = vadd.f32 %v2979_v15, %v2690_v61  ;;  %v1865_v35 = vadd.f32 %v5052_v59, %v3891_v8  ;;  %v2425_v21 = vadd.f32 %v5052_v59, %v4031_v11  ;;  %v2554_v43 = vmax.f32 %v1862_v17, 0.0 }
 0x1d1   :  { %v2552_v19 = vmax.f32 %v1854_v9, 0.0  ;;  %v2821_v20 = vadd.f32 %v2820_v7, %v2551_v6  ;;  %v1857_v22 = vadd.f32 %v5052_v59, %v1856_v12  ;;  %v2692_v27 = vmax.f32 %v2414_v56, 0.0 }
 0x1d2   :  { %v2417_v30 = vadd.f32 %v5052_v59, %v2416_v16  ;;  %v2981_v39 = vadd.f32 %v2980_v23, %v2691_v4  ;;  %v2694_v51 = vmax.f32 %v2422_v25, 0.0  ;;  %v2555_v54 = vmax.f32 %v1865_v35, 0.0 }
 0x1d3   :  { %v2822_v33 = vadd.f32 %v2821_v20, %v2552_v19  ;;  %v2553_v36 = vmax.f32 %v1857_v22, 0.0  ;;  %v2695_v6 = vmax.f32 %v2425_v21, 0.0 }
 0x1d4   :  { %v2693_v42 = vmax.f32 %v2417_v30, 0.0  ;;  %v2982_v52 = vadd.f32 %v2981_v39, %v2692_v27 }
 0x1d5   :  { %v2823_v44 = vadd.f32 %v2822_v33, %v2553_v36  ;;  %v3894_v47 = vpop.f32.mrb[112].mxu0  ;;  %v4034_v49 = vpop.f32.mrb[112].mxu1 }
 0x1d6   :  { %v1869_v50 = vpop.f32.mrb[113].mxu0  ;;  %v2429_v53 = vpop.f32.mrb[113].mxu1  ;;  %v2983_v7 = vadd.f32 %v2982_v52, %v2693_v42  ;;  %v1878_v8 = vadd.f32 %v5052_v59, %v3894_v47  ;;  %v2438_v15 = vadd.f32 %v5052_v59, %v4034_v49 }
 0x1d7   :  { %v2824_v57 = vadd.f32 %v2823_v44, %v2554_v43  ;;  %v1870_v60 = vadd.f32 %v5052_v59, %v1869_v50  ;;  %v3895_v34 = vpop.f32.mrb[114].mxu0  ;;  %v2430_v61 = vadd.f32 %v5052_v59, %v2429_v53  ;;  %v4035_v0 = vpop.f32.mrb[114].mxu1 }
 0x1d8   :  { %v1872_v1 = vpop.f32.mrb[115].mxu0  ;;  %v2432_v9 = vpop.f32.mrb[115].mxu1  ;;  %v2984_v4 = vadd.f32 %v2983_v7, %v2694_v51  ;;  %v1881_v20 = vadd.f32 %v5052_v59, %v3895_v34  ;;  %v2441_v25 = vadd.f32 %v5052_v59, %v4035_v0  ;;  %v2558_v30 = vmax.f32 %v1878_v8, 0.0 }
 0x1d9   :  { %v2556_v56 = vmax.f32 %v1870_v60, 0.0  ;;  %v2825_v11 = vadd.f32 %v2824_v57, %v2555_v54  ;;  %v1873_v12 = vadd.f32 %v5052_v59, %v1872_v1  ;;  %v2696_v16 = vmax.f32 %v2430_v61, 0.0 }
 0x1da   :  { %v2433_v17 = vadd.f32 %v5052_v59, %v2432_v9  ;;  %v2985_v23 = vadd.f32 %v2984_v4, %v2695_v6  ;;  %v2698_v39 = vmax.f32 %v2438_v15, 0.0  ;;  %v2559_v42 = vmax.f32 %v1881_v20, 0.0 }
 0x1db   :  { %v2826_v19 = vadd.f32 %v2825_v11, %v2556_v56  ;;  %v2557_v22 = vmax.f32 %v1873_v12, 0.0  ;;  %v2699_v50 = vmax.f32 %v2441_v25, 0.0 }
 0x1dc   :  { %v2697_v27 = vmax.f32 %v2433_v17, 0.0  ;;  %v2986_v21 = vadd.f32 %v2985_v23, %v2696_v16 }
 0x1dd   :  { %v2827_v33 = vadd.f32 %v2826_v19, %v2557_v22  ;;  %v3898_v35 = vpop.f32.mrb[116].mxu0 }
 0x1de   :  { %v1885_v36 = vpop.f32.mrb[117].mxu0  ;;  %v2987_v51 = vadd.f32 %v2986_v21, %v2697_v27  ;;  %v1894_v52 = vadd.f32 %v5052_v59, %v3898_v35 }
 0x1df   :  { %v2828_v43 = vadd.f32 %v2827_v33, %v2558_v30  ;;  %v1886_v44 = vadd.f32 %v5052_v59, %v1885_v36  ;;  %v3899_v47 = vpop.f32.mrb[118].mxu0 }
 0x1e0   :  { %v1888_v49 = vpop.f32.mrb[119].mxu0  ;;  %v2988_v60 = vadd.f32 %v2987_v51, %v2698_v39  ;;  %v1897_v61 = vadd.f32 %v5052_v59, %v3899_v47  ;;  %v2562_v6 = vmax.f32 %v1894_v52, 0.0 }
 0x1e1   :  { %v2560_v53 = vmax.f32 %v1886_v44, 0.0  ;;  %v2829_v54 = vadd.f32 %v2828_v43, %v2559_v42  ;;  %v1889_v57 = vadd.f32 %v5052_v59, %v1888_v49 }
 0x1e2   :  { %v5182_v1 = vadd.f32 %v2988_v60, %v2699_v50  ;;  %v2563_v56 = vmax.f32 %v1897_v61, 0.0 }
 0x1e3   :  { %v2830_v34 = vadd.f32 %v2829_v54, %v2560_v53  ;;  %v2561_v0 = vmax.f32 %v1889_v57, 0.0 }
 0x1e5   :  { %v2831_v7 = vadd.f32 %v2830_v34, %v2561_v0  ;;  %v3902_v9 = vpop.f32.mrb[120].mxu0 }
 0x1e6   :  { %v1901_v8 = vpop.f32.mrb[121].mxu0  ;;  %v1910_v16 = vadd.f32 %v5052_v59, %v3902_v9 }
 0x1e7   :  { %v2832_v11 = vadd.f32 %v2831_v7, %v2562_v6  ;;  %v1902_v12 = vadd.f32 %v5052_v59, %v1901_v8  ;;  %v3903_v4 = vpop.f32.mrb[122].mxu0 }
 0x1e8   :  { %v1904_v15 = vpop.f32.mrb[123].mxu0  ;;  %v1913_v23 = vadd.f32 %v5052_v59, %v3903_v4  ;;  %v2566_v27 = vmax.f32 %v1910_v16, 0.0 }
 0x1e9   :  { %v2564_v17 = vmax.f32 %v1902_v12, 0.0  ;;  %v2833_v19 = vadd.f32 %v2832_v11, %v2563_v56  ;;  %v1905_v20 = vadd.f32 %v5052_v59, %v1904_v15 }
 0x1ea   :  { %v2567_v36 = vmax.f32 %v1913_v23, 0.0 }
 0x1eb   :  { %v2834_v22 = vadd.f32 %v2833_v19, %v2564_v17  ;;  %v2565_v25 = vmax.f32 %v1905_v20, 0.0 }
 0x1ed   :  { %v2835_v30 = vadd.f32 %v2834_v22, %v2565_v25  ;;  %v3906_v33 = vpop.f32.mrb[124].mxu0 }
 0x1ee   :  { %v1917_v35 = vpop.f32.mrb[125].mxu0  ;;  %v1926_v44 = vadd.f32 %v5052_v59, %v3906_v33 }
 0x1ef   :  { %v2836_v39 = vadd.f32 %v2835_v30, %v2566_v27  ;;  %v1918_v21 = vadd.f32 %v5052_v59, %v1917_v35  ;;  %v3907_v42 = vpop.f32.mrb[126].mxu0 }
 0x1f0   :  { %v1920_v43 = vpop.f32.mrb[127].mxu0  ;;  %v1929_v52 = vadd.f32 %v5052_v59, %v3907_v42  ;;  %v2570_v54 = vmax.f32 %v1926_v44, 0.0  ;;  %v5201_v44 = vld [vmem:[%s5318_s2] ss:$0 sm:$0xff] }
 0x1f1   :  { %v2568_v47 = vmax.f32 %v1918_v21, 0.0  ;;  %v2837_v49 = vadd.f32 %v2836_v39, %v2567_v36  ;;  %v1921_v50 = vadd.f32 %v5052_v59, %v1920_v43 }
 0x1f2   :  { %v2571_v61 = vmax.f32 %v1929_v52, 0.0 }
 0x1f3   :  { %v2838_v51 = vadd.f32 %v2837_v49, %v2568_v47  ;;  %v2569_v53 = vmax.f32 %v1921_v50, 0.0 }
 0x1f5   :  { %v2839_v57 = vadd.f32 %v2838_v51, %v2569_v53  ;;  %v3910_v60 = vpop.f32.mrb[128].mxu0 }
 0x1f6   :  { %v1933_v34 = vpop.f32.mrb[129].mxu0  ;;  %v1942_v56 = vadd.f32 %v5052_v59, %v3910_v60 }
 0x1f7   :  { %v2840_v0 = vadd.f32 %v2839_v57, %v2570_v54  ;;  %v1934_v6 = vadd.f32 %v5052_v59, %v1933_v34  ;;  %v3911_v7 = vpop.f32.mrb[130].mxu0 }
 0x1f8   :  { %v1936_v9 = vpop.f32.mrb[131].mxu0  ;;  %v1945_v15 = vadd.f32 %v5052_v59, %v3911_v7  ;;  %v2574_v19 = vmax.f32 %v1942_v56, 0.0 }
 0x1f9   :  { %v2841_v8 = vadd.f32 %v2840_v0, %v2571_v61  ;;  %v1937_v11 = vadd.f32 %v5052_v59, %v1936_v9  ;;  %v2572_v4 = vmax.f32 %v1934_v6, 0.0 }
 0x1fa   :  { %v2575_v27 = vmax.f32 %v1945_v15, 0.0 }
 0x1fb   :  { %v2842_v12 = vrot.slane %v2841_v8, 4  ;;  %v2573_v16 = vmax.f32 %v1937_v11, 0.0 }
 0x1fd   :  { %v2843_v17 = vadd.f32 %v2842_v12, %v2841_v8  ;;  %v2848_v20 = vadd.f32 %v2573_v16, %v2572_v4  ;;  %v3914_v22 = vpop.f32.mrb[132].mxu0 }
 0x1fe   :  { %v1949_v23 = vpop.f32.mrb[133].mxu0  ;;  %v1958_v36 = vadd.f32 %v5052_v59, %v3914_v22 }
 0x1ff   :  { %v2844_v25 = vrot.slane %v2843_v17, 2  ;;  %v2849_v30 = vadd.f32 %v2848_v20, %v2574_v19  ;;  %v1950_v33 = vadd.f32 %v5052_v59, %v1949_v23  ;;  %v3915_v35 = vpop.f32.mrb[134].mxu0  ;;  %v1982_v20 = vadd.f32 %v5201_v44, %v4812_v62 }
 0x200   :  { %v1952_v39 = vpop.f32.mrb[135].mxu0  ;;  %v1961_v51 = vadd.f32 %v5201_v44, %v3915_v35  ;;  %v2578_v54 = vmax.f32 %v1958_v36, 0.0  ;;  %v1990_v35 = vadd.f32 %v5201_v44, %v4804_v58  ;;  %v2006_v58 = vadd.f32 %v5201_v44, %v4832_v14 }
 0x201   :  { %v2845_v21 = vadd.f32 %v2844_v25, %v2843_v17  ;;  %v2576_v42 = vmax.f32 %v1950_v33, 0.0  ;;  %v2850_v43 = vadd.f32 %v2849_v30, %v2575_v27  ;;  %v1953_v47 = vadd.f32 %v5201_v44, %v1952_v39 }
 0x202   :  { %v2579_v61 = vmax.f32 %v1961_v51, 0.0  ;;  %v1985_v27 = vadd.f32 %v5201_v44, %v4823_v5  ;;  %v2584_v36 = vmax.f32 %v1982_v20, 0.0  ;;  %v2001_v5 = vadd.f32 %v5201_v44, %v4848_v26 }
 0x203   :  { %v2846_v49 = vrot.slane %v2845_v21, 1  ;;  %v2851_v50 = vadd.f32 %v2850_v43, %v2576_v42  ;;  %v2577_v52 = vmax.f32 %v1953_v47, 0.0  ;;  %v2586_v43 = vmax.f32 %v1990_v35, 0.0 }
 0x204   :  { %v2585_v42 = vmax.f32 %v1985_v27, 0.0  ;;  %v2017_v26 = vadd.f32 %v5201_v44, %v4869_v48  ;;  %v2022_v14 = vadd.f32 %v5201_v44, %v4856_v37  ;;  %v2033_v48 = vadd.f32 %v5201_v44, %v4892_v13 }
 0x205   :  { %v2847_v53 = vadd.f32 %v2846_v49, %v2845_v21  ;;  %v2852_v57 = vadd.f32 %v2851_v50, %v2577_v52  ;;  %v3918_v59 = vpop.f32.mrb[136].mxu0  ;;  %v1993_v21 = vadd.f32 %v5201_v44, %v4818_v2  ;;  %v2009_v2 = vadd.f32 %v5201_v44, %v4846_v24 }
 0x206   :  { %v1965_v60 = vpop.f32.mrb[137].mxu0  ;;  %v1974_v9 = vadd.f32 %v5201_v44, %v3918_v59  ;;  %v2025_v24 = vadd.f32 %v5201_v44, %v4867_v46  ;;  %v2038_v37 = vadd.f32 %v5201_v44, %v4876_v63  ;;  %v2041_v46 = vadd.f32 %v5201_v44, %v4887_v10 }
 0x207   :  { %v2999_v34 = vmul.f32 0.00390625, %v2847_v53  ;;  %v2853_v0 = vadd.f32 %v2852_v57, %v2578_v54  ;;  %v1966_v6 = vadd.f32 %v5201_v44, %v1965_v60  ;;  %v3919_v7 = vpop.f32.mrb[138].mxu0  ;;  %v2587_v49 = vmax.f32 %v1993_v21, 0.0 }
 0x208   :  { %v1968_v8 = vpop.f32.mrb[139].mxu0  ;;  %v1977_v17 = vadd.f32 %v5201_v44, %v3919_v7  ;;  %v2582_v23 = vmax.f32 %v1974_v9, 0.0  ;;  %v2589_v53 = vmax.f32 %v2001_v5, 0.0  ;;  %v2590_v57 = vmax.f32 %v2006_v58, 0.0 }
 0x209   :  { %v3007_v56 = vpack.c.bf16 %v2999_v34, %v2999_v34  ;;  %v2580_v11 = vmax.f32 %v1966_v6, 0.0  ;;  %v2854_v12 = vadd.f32 %v2853_v0, %v2579_v61  ;;  %v1969_v4 = vadd.f32 %v5201_v44, %v1968_v8 }
 0x20a   :  { %v2583_v30 = vmax.f32 %v1977_v17, 0.0  ;;  %v2591_v60 = vmax.f32 %v2009_v2, 0.0  ;;  %v2593_v6 = vmax.f32 %v2017_v26, 0.0  ;;  %v2594_v9 = vmax.f32 %v2022_v14, 0.0 }
 0x20b   :  { %v3046_v15 = vunpack.c.l.b16 %v3007_v56  ;;  %v2855_v16 = vadd.f32 %v2854_v12, %v2580_v11  ;;  %v2581_v19 = vmax.f32 %v1969_v4, 0.0  ;;  %v2595_v56 = vmax.f32 %v2025_v24, 0.0 }
 0x20c   :  { %v2916_v17 = vrot.slane %v5025_v45, 4  ;;  %v2953_v20 = vrot.slane %v5106_v29, 4  ;;  %v2049_v63 = vadd.f32 %v5201_v44, %v4913_v41 }
 0x20d   :  { %v5212_v22 = vsel %vm3055_vm4, %v3046_v15, %v5160_v32  ;;  %v2856_v25 = vadd.f32 %v2855_v16, %v2581_v19  ;;  %v1998_v32 = vadd.f32 %v5201_v44, %v4840_v18  ;;  %v2014_v18 = vadd.f32 %v5201_v44, %v4861_v40 }
 0x20e   :  { %v2030_v40 = vadd.f32 %v5201_v44, %v4881_v3  ;;  %v2597_v15 = vmax.f32 %v2033_v48, 0.0  ;;  %v2598_v19 = vmax.f32 %v2038_v37, 0.0  ;;  %v2046_v3 = vadd.f32 %v5201_v44, %v4905_v31 }
 0x20f   :  { %v2857_v33 = vadd.f32 %v2856_v25, %v2582_v23  ;;  %v2588_v51 = vmax.f32 %v1998_v32, 0.0  ;;  %v2592_v61 = vmax.f32 %v2014_v18, 0.0  ;;  %v2990_v23 = vrot.slane %v5182_v1, 4 }
 0x210   :  { %v2596_v12 = vmax.f32 %v2030_v40, 0.0  ;;  %v2599_v25 = vmax.f32 %v2041_v46, 0.0  ;;  %v2917_v10 = vadd.f32 %v2916_v17, %v5025_v45  ;;  %v2954_v35 = vadd.f32 %v2953_v20, %v5106_v29  ;;  %v4241_v46 = vld [vmem:[%s5323_s7 + $0x10] sm:$0xff]   ;;  %v4244_v17 = vld [vmem:[%s5323_s7 + $0x28] sm:$0xff]   ;;  %v3590_v20 = vld [vmem:[%s5320_s4] ss:$0 sm:$0xff] }
 0x211   :  { %v2858_v39 = vadd.f32 %v2857_v33, %v2583_v30  ;;  %v2054_v30 = vadd.f32 %v5201_v44, %v4900_v28  ;;  %v2600_v33 = vmax.f32 %v2046_v3, 0.0  ;;  %v2991_v31 = vadd.f32 %v2990_v23, %v5182_v1  ;;  %v4246_v3 = vld [vmem:[%s5323_s7 + $0x38] sm:$0xff]  }
 0x212   :  { %v2601_v21 = vmax.f32 %v2049_v63, 0.0  ;;  %v2955_v41 = vrot.slane %v2954_v35, 2 }
 0x213   :  { %v2859_v62 = vadd.f32 %v2858_v39, %v2584_v36  ;;  %v2057_v39 = vadd.f32 %v5201_v44, %v4911_v38 }
 0x214   :  { %v2956_v28 = vadd.f32 %v2955_v41, %v2954_v35 }
 0x215   :  { %v2860_v47 = vadd.f32 %v2859_v62, %v2585_v42  ;;  %v2918_v62 = vrot.slane %v2917_v10, 2  ;;  %v2603_v45 = vmax.f32 %v2057_v39, 0.0 }
 0x217   :  { %v2861_v50 = vadd.f32 %v2860_v47, %v2586_v43  ;;  %v2602_v43 = vmax.f32 %v2054_v30, 0.0  ;;  %v2992_v47 = vrot.slane %v2991_v31, 2  ;;  %v2919_v5 = vadd.f32 %v2918_v62, %v2917_v10 }
 0x219   :  { %v2862_v52 = vadd.f32 %v2861_v50, %v2587_v49  ;;  %v2993_v58 = vadd.f32 %v2992_v47, %v2991_v31 }
 0x21b   :  { %v2863_v54 = vadd.f32 %v2862_v52, %v2588_v51  ;;  %v2920_v51 = vrot.slane %v2919_v5, 1  ;;  %v2957_v52 = vrot.slane %v2956_v28, 1  ;;  %v2994_v2 = vrot.slane %v2993_v58, 1 }
 0x21d   :  { %v2864_v59 = vadd.f32 %v2863_v54, %v2589_v53  ;;  %v2921_v38 = vadd.f32 %v2920_v51, %v2919_v5  ;;  %v2958_v44 = vadd.f32 %v2957_v52, %v2956_v28  ;;  %v3599_v28 = vld [vmem:[%s5321_s5] ss:$0 sm:$0xff]  ;;  %s4279_s5 = smov [#allocation2]  }
 0x21f   :  { %v2865_v34 = vadd.f32 %v2864_v59, %v2590_v57  ;;  %v2995_v57 = vadd.f32 %v2994_v2, %v2993_v58  ;;  %v3001_v59 = vmul.f32 0.00390625, %v2921_v38  ;;  %v3600_v58 = vld [vmem:[%s5322_s6] ss:$0 sm:$0xff]  ;;  %s3317_s6 = sshll.u32 %s4279_s5, 4  ;;  %s3318_s6 = int_to_ptr.vmem [resolvable:$true] %s3317_s6 }
 0x220   :  { %v3601_v2 = vld [vmem:[%s5324_s8] ss:$0 sm:$0xff]  ;;  %s4253_s13 = scalar_lea.vmem %s3318_s6, 128  ;;  %p4258_p1 = scmp.lt.s32.totalorder %s3318_s6, %s3318_s6 }
 0x221   :  { %v2866_v0 = vadd.f32 %v2865_v34, %v2591_v60  ;;  %v3002_v60 = vmul.f32 0.00390625, %v2958_v44  ;;  %v3003_v34 = vmul.f32 0.00390625, %v2995_v57  ;;  %p4254_p0 = scmp.ne.s32.totalorder %s3318_s6, %s4253_s13  ;;  %p4259_p2 = scmp.lt.s32.totalorder %s4253_s13, %s4253_s13 }
 0x223   :  { %v2867_v7 = vadd.f32 %v2866_v0, %v2592_v61  ;;  %v3009_v61 = vpack.c.bf16 %v3001_v59, %v3001_v59  ;;  %v3010_v0 = vpack.c.bf16 %v3002_v60, %v3002_v60  ;;  %p4260_p3 = por %p4259_p2, %p4258_p1 }
 0x225   :  { %v2868_v8 = vadd.f32 %v2867_v7, %v2593_v6  ;;  %v3011_v6 = vpack.c.bf16 %v3003_v34, %v3003_v34  ;;  %v3049_v40 = vunpack.c.l.b16 %v3010_v0  ;;  %p4261_p4 = pnand %p4260_p3, %p4254_p0 }
 0x227   :  { %v2869_v11 = vadd.f32 %v2868_v8, %v2594_v9  ;;  %v3048_v9 = vunpack.c.l.b16 %v3009_v61 }
 0x229   :  { %v2870_v4 = vadd.f32 %v2869_v11, %v2595_v56  ;;  %v3050_v56 = vunpack.c.l.b16 %v3011_v6 }
 0x22b   :  { %v2871_v16 = vadd.f32 %v2870_v4, %v2596_v12  ;;  %v4239_v4 = vld [vmem:[%s5323_s7] sm:$0xff]  }
 0x22d   :  { %v2872_v13 = vadd.f32 %v2871_v16, %v2597_v15  ;;  %v4242_v15 = vld [vmem:[%s5323_s7 + $0x18] sm:$0xff]   ;;  %v4243_v16 = vld [vmem:[%s5323_s7 + $0x20] sm:$0xff]  }
 0x22f   :  { %v2873_v27 = vadd.f32 %v2872_v13, %v2598_v19  ;;  %v4245_v19 = vld [vmem:[%s5323_s7 + $0x30] sm:$0xff]  }
 0x231   :  { %v2874_v36 = vadd.f32 %v2873_v27, %v2599_v25 }
 0x233   :  { %v2875_v42 = vadd.f32 %v2874_v36, %v2600_v33 }
 0x235   :  { %v2876_v32 = vadd.f32 %v2875_v42, %v2601_v21 }
 0x237   :  { %v2877_v49 = vadd.f32 %v2876_v32, %v2602_v43 }
 0x239   :  { %v2878_v50 = vadd.f32 %v2877_v49, %v2603_v45 }
 0x23b   :  { %v2879_v29 = vrot.slane %v2878_v50, 4 }
 0x23d   :  { %v2880_v1 = vadd.f32 %v2879_v29, %v2878_v50 }
 0x23f   :  { %v2881_v53 = vrot.slane %v2880_v1, 2 }
 0x241   :  { %v2882_v54 = vadd.f32 %v2881_v53, %v2880_v1 }
 0x243   :  { %v2883_v18 = vrot.slane %v2882_v54, 1 }
 0x245   :  { %v2884_v26 = vadd.f32 %v2883_v18, %v2882_v54 }
 0x247   :  { %v3000_v14 = vmul.f32 0.00390625, %v2884_v26 }
 0x249   :  { %v3008_v24 = vpack.c.bf16 %v3000_v14, %v3000_v14 }
 0x24b   :  { %v3047_v7 = vunpack.c.l.b16 %v3008_v24 }
 0x24d   :  { %v3058_v8 = vsel %vm3057_vm5, %v3047_v7, %v5212_v22  ;;  %v4240_v22 = vld [vmem:[%s5323_s7 + $0x8] sm:$0xff]  }
 0x24e   :  { %v3060_v48 = vsel %vm3059_vm6, %v3048_v9, %v3058_v8 }
 0x24f   :  { %v3062_v11 = vsel %vm3061_vm7, %v3049_v40, %v3060_v48 }
 0x250   :  { %v3064_v37 = vsel %vm3063_vm8, %v3050_v56, %v3062_v11 }
 0x251   :  { %v3065_v12 = vpack.c.b16 %v3064_v37, %v3064_v37 }
 0x253   :  { %4053 = vmatmul.mubr.bf16.vlgmr.msra.gmra.mrb[116].mxu1 %v3065_v12 }
 0x254   :  { %4072 = vmatprep.mubr.msk.bf16.mxu1 %vm4278_vm2, %v4277_v55  ;;  %4057 = vmatpush3.bf16.msra.mxu1 %v4239_v4 }
 0x255   :  { %4058 = vmatprep.subr.bf16.mxu1 %v4277_v55 }
 0x258   :  { %4059 = vmatpush3.bf16.msra.mxu1 %v4240_v22 }
 0x259   :  { %4060 = vmatprep.subr.bf16.mxu1 %v4277_v55 }
 0x25c   :  { %4061 = vmatpush3.bf16.msra.mxu1 %v4241_v46 }
 0x25d   :  { %4062 = vmatprep.subr.bf16.mxu1 %v4277_v55 }
 0x260   :  { %4063 = vmatpush3.bf16.msra.mxu1 %v4242_v15 }
 0x261   :  { %4064 = vmatprep.subr.bf16.mxu1 %v4277_v55 }
 0x264   :  { %4065 = vmatpush3.bf16.msra.mxu1 %v4243_v16 }
 0x265   :  { %4066 = vmatprep.subr.bf16.mxu1 %v4277_v55 }
 0x268   :  { %4067 = vmatpush3.bf16.msra.mxu1 %v4244_v17 }
 0x269   :  { %4068 = vmatprep.subr.bf16.mxu1 %v4277_v55 }
 0x26c   :  { %4069 = vmatpush3.bf16.msra.mxu1 %v4245_v19 }
 0x26d   :  { %4070 = vmatprep.subr.bf16.mxu1 %v4277_v55 }
 0x270   :  { %4071 = vmatpush3.bf16.msra.mxu1 %v4246_v3 }
 0x326   :  { %v3149_v13 = vpop.f32.mrb[116].mxu1 }
 0x327   :  { %v3150_v23 = vadd.f32 %v3590_v20, %v3149_v13  ;;  %v4054_v25 = vpop.f32.mrb[117].mxu1 }
 0x328   :  { %v3152_v63 = vpop.f32.mrb[118].mxu1 }
 0x329   :  { %v3155_v27 = vrot.slane %v3150_v23, 4  ;;  %v4055_v10 = vpop.f32.mrb[119].mxu1 }
 0x32b   :  { %v3156_v30 = vadd.f32 %v3155_v27, %v3150_v23 }
 0x32d   :  { %v3157_v33 = vrot.slane %v3156_v30, 2 }
 0x32f   :  { %v3158_v35 = vadd.f32 %v3157_v33, %v3156_v30 }
 0x331   :  { %v3159_v36 = vrot.slane %v3158_v35, 1 }
 0x333   :  { %v3160_v31 = vadd.f32 %v3159_v36, %v3158_v35 }
 0x335   :  { %v3162_v39 = vmul.f32 0.125, %v3160_v31 }
 0x337   :  { %v3163_v21 = vsub.f32 %v3150_v23, %v3162_v39 }
 0x339   :  { %v3164_v42 = vmul.f32 %v3163_v21, %v3163_v21 }
 0x33b   :  { %v3165_v55 = vrot.slane %v3164_v42, 4 }
 0x33d   :  { %v3166_v62 = vadd.f32 %v3165_v55, %v3164_v42 }
 0x33f   :  { %v3167_v43 = vrot.slane %v3166_v62, 2 }
 0x341   :  { %v3168_v41 = vadd.f32 %v3167_v43, %v3166_v62 }
 0x343   :  { %v3169_v32 = vrot.slane %v3168_v41, 1 }
 0x345   :  { %v3170_v47 = vadd.f32 %v3169_v32, %v3168_v41 }
 0x347   :  { %v3171_v45 = vmul.f32 0.125, %v3170_v47 }
 0x349   :  { %v3172_v49 = vadd.f32 1e-05, %v3171_v45 }
 0x34b   :  { %4247 = vrsqrt.f32 %v3172_v49 }
 0x355   :  { %v4248_v5 = vpop.eup %4247 }
 0x356   :  { %v3174_v50 = vmul.f32 %v4248_v5, %v3163_v21 }
 0x358   :  { %v3182_v29 = vmul.f32 %v3599_v28, %v3174_v50 }
 0x35a   :  { %v3190_v51 = vadd.f32 %v3600_v58, %v3182_v29 }
 0x35c   :  { %v3191_v52 = vmax.f32 %v3190_v51, 0.0 }
 0x35e   :  { %v3192_v1 = vpack.c.bf16 %v3191_v52, %v3191_v52 }
 0x360   :  { %4073 = vmatmul.mubr.bf16.vlgmr.msra.gmra.mrb[120].mxu1 %v3192_v1 }
 0x433   :  { %v3298_v53 = vpop.f32.mrb[120].mxu1 }
 0x434   :  { %v3299_v38 = vadd.f32 %v3601_v2, %v3298_v53  ;;  %v4074_v44 = vpop.f32.mrb[121].mxu1 }
 0x435   :  { %v3301_v54 = vpop.f32.mrb[122].mxu1 }
 0x436   :  { %v4075_v57 = vpop.f32.mrb[123].mxu1  ;;  %v3304_v18 = vmul.f32 %v3299_v38, %v3299_v38 }
 0x438   :  { %3305 = vadd.xlane.f32.xlu0 %v3304_v18 }
 0x4c5   :  { %v3306_v59 = vpop.xlane.xlu0 %3305 }
 0x4c6   :  { %v3307_v60 = vmax.f32 %v3306_v59, 1e-24 }
 0x4c8   :  { %4249 = vrsqrt.f32 %v3307_v60 }
 0x4d2   :  { %v4250_v26 = vpop.eup %4249 }
 0x4d3   :  { %v3309_v34 = vmul.f32 %v4250_v26, %v3299_v38 }
 0x4d5   :  { %3310 = vst [vmem:[#allocation2] sm:$0xff] %v3309_v34 }
 0x4d6   :  { %4264 = shalt.err (!%p4261_p4)
}
 0x4d7   :  { %s4265_s14 = scalar_lea.hbm %s5325_s9, 128 }
 0x4d8   :  { %p4266_p5 = scmp.ne.s32.totalorder %s5325_s9, %s4265_s14  ;;  %p4269_p6 = scmp.lt.u32.totalorder %s4265_s14, %s5325_s9 }
 0x4da   :  { %p4271_p7 = pnand %p4269_p6, %p4266_p5 }
 0x4dc   :  { %4274 = shalt.err (!%p4271_p7)
}
 0x4dd   :  { %3320 = dma.vmem_to_hbm [thread:$0]  %s3318_s6, 128, %s5325_s9, [#allocation3]  }
 0x4de   :  { %4275 = dma.done.wait [#allocation3], 128  }
 0x4df   :  { %4276 = vsyncadd [#allocation3], 4294967168 }
 0x4e0   :  { %3324 = vsyncpa [#allocation3], 1 }

</bundles_post_ra>
